<compile_context>
chip_gen: v7x
topology: tpu7x:2x2x1
jax: 0.10.0
libtpu: 0.0.40
codegen_flags: <defaults>
</compile_context>

<pallas_src>
import functools
import math

import jax
import jax.numpy as jnp
from jax import lax
from jax.experimental import pallas as pl
from jax.experimental.pallas import tpu as pltpu


def _layer_norm(x, gamma, beta, eps=1e-5):
    mu = jnp.mean(x, axis=-1, keepdims=True)
    var = jnp.mean((x - mu) ** 2, axis=-1, keepdims=True)
    return (x - mu) * lax.rsqrt(var + eps) * gamma + beta


def transformer_layer_kernel(
    x_ref,
    ln1_g_ref, ln1_b_ref,
    wqkv_ref,
    wo_ref, bo_ref,
    ln2_g_ref, ln2_b_ref,
    w1_ref, b1_ref,
    w2_ref, b2_ref,
    out_ref,
    *, heads: int, dim_head: int, seq_len: int,
):
    d = pl.program_id(1)

    # Layer 0: seed the depth-resident output block with the input slab.
    # out_ref's block index is constant along the depth axis, so it stays in
    # VMEM and carries x (f32) across layers without touching HBM.
    @pl.when(d == 0)
    def _():
        out_ref[...] = x_ref[...]

    x = out_ref[...]                                   # (M, D) f32, M = TB * N
    m, _ = x.shape
    tb = m // seq_len
    inner = heads * dim_head
    scale = dim_head ** -0.5

    # ---- Attention branch (pre-norm) ----
    xn = _layer_norm(x, ln1_g_ref[0], ln1_b_ref[0])    # f32 elementwise
    qkv = jnp.dot(xn.astype(jnp.bfloat16), wqkv_ref[0],
                  preferred_element_type=jnp.float32)  # (M, 3*inner), one MXU pass
    q = qkv[:, 0 * inner:1 * inner] * scale            # fold 1/sqrt(dh) into q
    k = qkv[:, 1 * inner:2 * inner]
    v = qkv[:, 2 * inner:3 * inner]

    # Split the folded batch back out for the (N, N) attention matmuls.
    # (M, inner) -> (TB, N, inner) only re-groups sublane tiles (N rows each).
    q3 = q.reshape(tb, seq_len, inner).astype(jnp.bfloat16)
    k3 = k.reshape(tb, seq_len, inner).astype(jnp.bfloat16)
    v3 = v.reshape(tb, seq_len, inner).astype(jnp.bfloat16)

    head_outs = []
    for h in range(heads):
        lo = h * dim_head
        qh = q3[:, :, lo:lo + dim_head]
        kh = k3[:, :, lo:lo + dim_head]
        vh = v3[:, :, lo:lo + dim_head]
        # Batched over the TB batch elements in this block.
        s = jnp.einsum('bqd,bkd->bqk', qh, kh,
                       preferred_element_type=jnp.float32)             # (TB, N, N) f32
        s = s - jnp.max(s, axis=-1, keepdims=True)
        p = jnp.exp(s)
        p = p * pl.reciprocal(jnp.sum(p, axis=-1, keepdims=True), approx=True)
        head_outs.append(jnp.einsum('bqk,bkd->bqd', p.astype(jnp.bfloat16), vh,
                                    preferred_element_type=jnp.float32))  # (TB, N, Dh)

    o = head_outs[0] if heads == 1 else jnp.concatenate(head_outs, axis=-1)
    o = o.reshape(m, inner)                                             # (M, inner)
    attn = jnp.dot(o.astype(jnp.bfloat16), wo_ref[0],
                   preferred_element_type=jnp.float32)                  # (M, D)
    x = x + attn + bo_ref[0]

    # ---- FeedForward branch (pre-norm) ----
    xn2 = _layer_norm(x, ln2_g_ref[0], ln2_b_ref[0])
    h1 = jnp.dot(xn2.astype(jnp.bfloat16), w1_ref[0],
                 preferred_element_type=jnp.float32) + b1_ref[0]
    h1 = 0.5 * h1 * (1.0 + lax.erf(h1 * (1.0 / math.sqrt(2.0))))        # exact GELU, f32
    y = jnp.dot(h1.astype(jnp.bfloat16), w2_ref[0],
                preferred_element_type=jnp.float32) + b2_ref[0]

    out_ref[...] = x + y


def _pick_block_batch(B, N, target_rows=256, max_rows=2048):
    """Largest divisor of B whose block has <= max_rows rows, preferring >= target_rows."""
    tb = 1
    for cand in range(1, B + 1):
        if B % cand != 0:
            continue
        if cand * N > max_rows:
            break
        tb = cand
        if cand * N >= target_rows:
            break
    # Keep the block's second-minor dim legal ((8,128) rule) if N is awkward.
    if (tb * N) % 8 != 0:
        tb = B
    return tb


def transformer_forward(x, params, *, heads, dim_head, block_batch=None):
    """x: (B, N, D) float32; params: stacked per-layer weights (depth-leading)."""
    B, N, D = x.shape
    depth = params["wqkv"].shape[0]
    inner = heads * dim_head
    mlp_dim = params["w1"].shape[-1]

    tb = block_batch if block_batch is not None else _pick_block_batch(B, N)
    assert B % tb == 0
    nb = B // tb
    M = tb * N

    # Present x / out as 2-D (B*N, D) slabs: batch folded into the matmul M dim.
    x2d = x.reshape(B * N, D)

    def wspec(*shape):  # per-layer weight block, indexed by the depth grid axis
        return pl.BlockSpec((1,) + shape, lambda b, d: (d,) + (0,) * len(shape))

    in_specs = [
        pl.BlockSpec((M, D), lambda b, d: (b, 0)),         # x slab (TB*N, D)
        wspec(1, D), wspec(1, D),                          # ln1 gamma / beta
        wspec(D, 3 * inner),                               # fused Wqkv (bf16)
        wspec(inner, D), wspec(1, D),                      # Wo (bf16), bo
        wspec(1, D), wspec(1, D),                          # ln2 gamma / beta
        wspec(D, mlp_dim), wspec(1, mlp_dim),              # W1 (bf16), b1
        wspec(mlp_dim, D), wspec(1, D),                    # W2 (bf16), b2
    ]
    out_spec = pl.BlockSpec((M, D), lambda b, d: (b, 0))

    # Advisory cost estimate over the whole problem.
    flops = depth * (2 * B * N * D * 3 * inner        # qkv projection
                     + 4 * B * N * N * inner          # qk^T + p@v over all heads
                     + 2 * B * N * inner * D          # output projection
                     + 4 * B * N * D * mlp_dim)       # ff1 + ff2
    weight_bytes_per_layer = ((D * 3 * inner + inner * D + D * mlp_dim + mlp_dim * D) * 2
                              + (6 * D + mlp_dim) * 4)
    cost = pl.CostEstimate(
        flops=flops,
        transcendentals=depth * (B * heads * N * N + B * N * mlp_dim + 2 * B * N),
        bytes_accessed=depth * nb * weight_bytes_per_layer + 2 * B * N * D * 4,
    )

    # Explicit VMEM budget: above the default scoped limit, below physical capacity.
    try:
        cap = pltpu.get_tpu_info().vmem_capacity_bytes
        vmem_limit = min(int(cap * 3 // 4), 96 * 1024 * 1024)
    except Exception:
        vmem_limit = 48 * 1024 * 1024

    kernel = functools.partial(transformer_layer_kernel,
                               heads=heads, dim_head=dim_head, seq_len=N)

    out2d = pl.pallas_call(
        kernel,
        out_shape=jax.ShapeDtypeStruct((B * N, D), jnp.float32),
        grid_spec=pltpu.PrefetchScalarGridSpec(
            num_scalar_prefetch=0,
            grid=(nb, depth),              # depth innermost: sequential layer carry
            in_specs=in_specs,
            out_specs=out_spec,
        ),
        compiler_params=pltpu.CompilerParams(
            dimension_semantics=("parallel", "arbitrary"),
            vmem_limit_bytes=vmem_limit,
        ),
        cost_estimate=cost,
    )(
        x2d,
        params["ln1_g"], params["ln1_b"],
        params["wqkv"],
        params["wo"], params["bo"],
        params["ln2_g"], params["ln2_b"],
        params["w1"], params["b1"],
        params["w2"], params["b2"],
    )
    return out2d.reshape(B, N, D)


def init_params(key, depth, dim, heads, dim_head, mlp_dim):
    inner = heads * dim_head
    ks = jax.random.split(key, 4)
    s = 0.02

    def w(k, shape):  # matmul weights stored in bf16 (half the DMA / VMEM bytes)
        return (s * jax.random.normal(k, shape, jnp.float32)).astype(jnp.bfloat16)

    return {
        "ln1_g": jnp.ones((depth, 1, dim), jnp.float32),
        "ln1_b": jnp.zeros((depth, 1, dim), jnp.float32),
        "wqkv": w(ks[0], (depth, dim, 3 * inner)),
        "wo": w(ks[1], (depth, inner, dim)),
        "bo": jnp.zeros((depth, 1, dim), jnp.float32),
        "ln2_g": jnp.ones((depth, 1, dim), jnp.float32),
        "ln2_b": jnp.zeros((depth, 1, dim), jnp.float32),
        "w1": w(ks[2], (depth, dim, mlp_dim)),
        "b1": jnp.zeros((depth, 1, mlp_dim), jnp.float32),
        "w2": w(ks[3], (depth, mlp_dim, dim)),
        "b2": jnp.zeros((depth, 1, dim), jnp.float32),
    }


if __name__ == "__main__":
    # Small shapes consistent with the module's forward.
    B, N = 2, 8
    dim, depth, heads, dim_head, mlp_dim = 32, 2, 4, 8, 64

    key = jax.random.PRNGKey(0)
    key_x, key_p = jax.random.split(key)
    x = jax.random.normal(key_x, (B, N, dim), jnp.float32)
    params = init_params(key_p, depth, dim, heads, dim_head, mlp_dim)

    out = transformer_forward(x, params, heads=heads, dim_head=dim_head)
    out = jax.block_until_ready(out)
    assert out.shape == (B, N, dim)
    assert bool(jnp.all(jnp.isfinite(out)))
    print("KERNEL_OK")
</pallas_src>

<mosaic_0001>
module attributes {stable_mosaic.version = 11 : i64} {
  func.func @transformer_layer_kernel(%arg0: i32, %arg1: i32, %arg2: memref<16x32xf32, #tpu.memory_space<vmem>>, %arg3: memref<1x1x32xf32, #tpu.memory_space<vmem>>, %arg4: memref<1x1x32xf32, #tpu.memory_space<vmem>>, %arg5: memref<1x32x96xbf16, #tpu.memory_space<vmem>>, %arg6: memref<1x32x32xbf16, #tpu.memory_space<vmem>>, %arg7: memref<1x1x32xf32, #tpu.memory_space<vmem>>, %arg8: memref<1x1x32xf32, #tpu.memory_space<vmem>>, %arg9: memref<1x1x32xf32, #tpu.memory_space<vmem>>, %arg10: memref<1x32x64xbf16, #tpu.memory_space<vmem>>, %arg11: memref<1x1x64xf32, #tpu.memory_space<vmem>>, %arg12: memref<1x64x32xbf16, #tpu.memory_space<vmem>>, %arg13: memref<1x1x32xf32, #tpu.memory_space<vmem>>, %arg14: memref<16x32xf32, #tpu.memory_space<vmem>>) attributes {dimension_semantics = [#tpu.dimension_semantics<parallel>, #tpu.dimension_semantics<arbitrary>], iteration_bounds = array<i64: 1, 2>, scalar_prefetch = 0 : i64, scratch_operands = 0 : i64, tpu.core_type = #tpu.core_type<tc>, window_params = [{transform_indices = @transform_0, window_bounds = array<i64: 16, 32>}, {transform_indices = @transform_1, window_bounds = array<i64: 1, 1, 32>}, {transform_indices = @transform_2, window_bounds = array<i64: 1, 1, 32>}, {transform_indices = @transform_3, window_bounds = array<i64: 1, 32, 96>}, {transform_indices = @transform_4, window_bounds = array<i64: 1, 32, 32>}, {transform_indices = @transform_5, window_bounds = array<i64: 1, 1, 32>}, {transform_indices = @transform_6, window_bounds = array<i64: 1, 1, 32>}, {transform_indices = @transform_7, window_bounds = array<i64: 1, 1, 32>}, {transform_indices = @transform_8, window_bounds = array<i64: 1, 32, 64>}, {transform_indices = @transform_9, window_bounds = array<i64: 1, 1, 64>}, {transform_indices = @transform_10, window_bounds = array<i64: 1, 64, 32>}, {transform_indices = @transform_11, window_bounds = array<i64: 1, 1, 32>}, {transform_indices = @transform_12, window_bounds = array<i64: 16, 32>}]} {
    %c0_i32 = arith.constant 0 : i32
    %0 = arith.cmpi eq, %arg1, %c0_i32 : i32
    %1 = arith.extui %0 : i1 to i32
    %c0_i32_0 = arith.constant 0 : i32
    %2 = arith.cmpi ne, %1, %c0_i32_0 : i32
    scf.if %2 {
      %c0_70 = arith.constant 0 : index
      %c0_71 = arith.constant 0 : index
      %172 = vector.load %arg2[%c0_70, %c0_71] : memref<16x32xf32, #tpu.memory_space<vmem>>, vector<16x32xf32>
      %c0_72 = arith.constant 0 : index
      %c0_73 = arith.constant 0 : index
      %173 = vector.load %arg14[%c0_72, %c0_73] : memref<16x32xf32, #tpu.memory_space<vmem>>, vector<16x32xf32>
      tpu.vector_store %arg14[%c0_72, %c0_73], %172 {strides = array<i32>} : memref<16x32xf32, #tpu.memory_space<vmem>>, vector<16x32xf32>,
    } else {
    }
    %c0 = arith.constant 0 : index
    %c0_1 = arith.constant 0 : index
    %3 = vector.load %arg14[%c0, %c0_1] : memref<16x32xf32, #tpu.memory_space<vmem>>, vector<16x32xf32>
    %c0_2 = arith.constant 0 : index
    %c0_3 = arith.constant 0 : index
    %c0_4 = arith.constant 0 : index
    %4 = vector.load %arg3[%c0_2, %c0_3, %c0_4] : memref<1x1x32xf32, #tpu.memory_space<vmem>>, vector<1x1x32xf32>
    %5 = vector.shape_cast %4 : vector<1x1x32xf32> to vector<1x32xf32>
    %c0_5 = arith.constant 0 : index
    %c0_6 = arith.constant 0 : index
    %c0_7 = arith.constant 0 : index
    %6 = vector.load %arg4[%c0_5, %c0_6, %c0_7] : memref<1x1x32xf32, #tpu.memory_space<vmem>>, vector<1x1x32xf32>
    %7 = vector.shape_cast %6 : vector<1x1x32xf32> to vector<1x32xf32>
    %cst = arith.constant dense<0.000000e+00> : vector<16xf32>
    %8 = vector.multi_reduction <add>, %3, %cst [1] : vector<16x32xf32> to vector<16xf32>
    %9 = vector.shape_cast %8 : vector<16xf32> to vector<16x1xf32>
    %cst_8 = arith.constant 3.200000e+01 : f32
    %10 = vector.broadcast %cst_8 : f32 to vector<16x1xf32>
    %11 = arith.divf %9, %10 : vector<16x1xf32>
    %12 = vector.broadcast %11 : vector<16x1xf32> to vector<16x32xf32>
    %13 = arith.subf %3, %12 : vector<16x32xf32>
    %14 = arith.mulf %13, %13 : vector<16x32xf32>
    %cst_9 = arith.constant dense<0.000000e+00> : vector<16xf32>
    %15 = vector.multi_reduction <add>, %14, %cst_9 [1] : vector<16x32xf32> to vector<16xf32>
    %16 = vector.shape_cast %15 : vector<16xf32> to vector<16x1xf32>
    %cst_10 = arith.constant 3.200000e+01 : f32
    %17 = vector.broadcast %cst_10 : f32 to vector<16x1xf32>
    %18 = arith.divf %16, %17 : vector<16x1xf32>
    %19 = vector.broadcast %11 : vector<16x1xf32> to vector<16x32xf32>
    %20 = arith.subf %3, %19 : vector<16x32xf32>
    %cst_11 = arith.constant 9.99999974E-6 : f32
    %21 = vector.broadcast %cst_11 : f32 to vector<16x1xf32>
    %22 = arith.addf %18, %21 : vector<16x1xf32>
    %23 = math.rsqrt %22 : vector<16x1xf32>
    %24 = vector.broadcast %23 : vector<16x1xf32> to vector<16x32xf32>
    %25 = arith.mulf %20, %24 : vector<16x32xf32>
    %26 = vector.broadcast %5 : vector<1x32xf32> to vector<16x32xf32>
    %27 = arith.mulf %25, %26 : vector<16x32xf32>
    %28 = vector.broadcast %7 : vector<1x32xf32> to vector<16x32xf32>
    %29 = arith.addf %27, %28 : vector<16x32xf32>
    %30 = arith.truncf %29 : vector<16x32xf32> to vector<16x32xbf16>
    %c0_12 = arith.constant 0 : index
    %c0_13 = arith.constant 0 : index
    %c0_14 = arith.constant 0 : index
    %31 = vector.load %arg5[%c0_12, %c0_13, %c0_14] : memref<1x32x96xbf16, #tpu.memory_space<vmem>>, vector<1x32x96xbf16>
    %32 = vector.shape_cast %31 : vector<1x32x96xbf16> to vector<32x96xbf16>
    %cst_15 = arith.constant dense<0.000000e+00> : vector<16x96xf32>
    %33 = tpu.matmul %30, %32, %cst_15 {dimension_numbers = #tpu.dot_dimension_numbers<[1], [0], [0], [1], [0, 0, 1, 1], [], []>} : vector<16x32xbf16>, vector<32x96xbf16>, vector<16x96xf32> -> vector<16x96xf32>
    %34 = vector.extract_strided_slice %33 {offsets = [0, 0], sizes = [16, 32], strides = [1, 1]} : vector<16x96xf32> to vector<16x32xf32>
    %cst_16 = arith.constant 0.353553385 : f32
    %35 = vector.broadcast %cst_16 : f32 to vector<16x32xf32>
    %36 = arith.mulf %34, %35 : vector<16x32xf32>
    %37 = vector.extract_strided_slice %33 {offsets = [0, 32], sizes = [16, 32], strides = [1, 1]} : vector<16x96xf32> to vector<16x32xf32>
    %38 = vector.extract_strided_slice %33 {offsets = [0, 64], sizes = [16, 32], strides = [1, 1]} : vector<16x96xf32> to vector<16x32xf32>
    %39 = vector.shape_cast %36 : vector<16x32xf32> to vector<2x8x32xf32>
    %40 = arith.truncf %39 : vector<2x8x32xf32> to vector<2x8x32xbf16>
    %41 = vector.shape_cast %37 : vector<16x32xf32> to vector<2x8x32xf32>
    %42 = arith.truncf %41 : vector<2x8x32xf32> to vector<2x8x32xbf16>
    %43 = vector.shape_cast %38 : vector<16x32xf32> to vector<2x8x32xf32>
    %44 = arith.truncf %43 : vector<2x8x32xf32> to vector<2x8x32xbf16>
    %45 = vector.extract_strided_slice %40 {offsets = [0, 0, 0], sizes = [2, 8, 8], strides = [1, 1, 1]} : vector<2x8x32xbf16> to vector<2x8x8xbf16>
    %46 = vector.extract_strided_slice %42 {offsets = [0, 0, 0], sizes = [2, 8, 8], strides = [1, 1, 1]} : vector<2x8x32xbf16> to vector<2x8x8xbf16>
    %47 = vector.extract_strided_slice %44 {offsets = [0, 0, 0], sizes = [2, 8, 8], strides = [1, 1, 1]} : vector<2x8x32xbf16> to vector<2x8x8xbf16>
    "tpu.trace_start"() <{level = 10 : i32, message = "bqd,bkd->bqk"}> : () -> ()
    %cst_17 = arith.constant dense<0.000000e+00> : vector<2x8x8xf32>
    %48 = tpu.matmul %45, %46, %cst_17 {dimension_numbers = #tpu.dot_dimension_numbers<[2], [2], [1], [1], [0, 0, 0, 1, 1, 1], [0], [0]>} : vector<2x8x8xbf16>, vector<2x8x8xbf16>, vector<2x8x8xf32> -> vector<2x8x8xf32>
    "tpu.trace_stop"() : () -> ()
    %cst_18 = arith.constant dense<0xFF800000> : vector<2x8xf32>
    %49 = vector.multi_reduction <maximumf>, %48, %cst_18 [2] : vector<2x8x8xf32> to vector<2x8xf32>
    %50 = vector.shape_cast %49 : vector<2x8xf32> to vector<2x8x1xf32>
    %51 = vector.broadcast %50 : vector<2x8x1xf32> to vector<2x8x8xf32>
    %52 = arith.subf %48, %51 : vector<2x8x8xf32>
    %53 = math.exp %52 : vector<2x8x8xf32>
    %cst_19 = arith.constant dense<0.000000e+00> : vector<2x8xf32>
    %54 = vector.multi_reduction <add>, %53, %cst_19 [2] : vector<2x8x8xf32> to vector<2x8xf32>
    %55 = vector.shape_cast %54 : vector<2x8xf32> to vector<2x8x1xf32>
    %56 = tpu.reciprocal %55 {approx = true} : vector<2x8x1xf32> -> vector<2x8x1xf32>
    %57 = vector.broadcast %56 : vector<2x8x1xf32> to vector<2x8x8xf32>
    %58 = arith.mulf %53, %57 : vector<2x8x8xf32>
    %59 = arith.truncf %58 : vector<2x8x8xf32> to vector<2x8x8xbf16>
    "tpu.trace_start"() <{level = 10 : i32, message = "bqk,bkd->bqd"}> : () -> ()
    %cst_20 = arith.constant dense<0.000000e+00> : vector<2x8x8xf32>
    %60 = tpu.matmul %59, %47, %cst_20 {dimension_numbers = #tpu.dot_dimension_numbers<[2], [1], [1], [2], [0, 0, 0, 1, 1, 2], [0], [0]>} : vector<2x8x8xbf16>, vector<2x8x8xbf16>, vector<2x8x8xf32> -> vector<2x8x8xf32>
    "tpu.trace_stop"() : () -> ()
    %61 = vector.extract_strided_slice %40 {offsets = [0, 0, 8], sizes = [2, 8, 8], strides = [1, 1, 1]} : vector<2x8x32xbf16> to vector<2x8x8xbf16>
    %62 = vector.extract_strided_slice %42 {offsets = [0, 0, 8], sizes = [2, 8, 8], strides = [1, 1, 1]} : vector<2x8x32xbf16> to vector<2x8x8xbf16>
    %63 = vector.extract_strided_slice %44 {offsets = [0, 0, 8], sizes = [2, 8, 8], strides = [1, 1, 1]} : vector<2x8x32xbf16> to vector<2x8x8xbf16>
    "tpu.trace_start"() <{level = 10 : i32, message = "bqd,bkd->bqk"}> : () -> ()
    %cst_21 = arith.constant dense<0.000000e+00> : vector<2x8x8xf32>
    %64 = tpu.matmul %61, %62, %cst_21 {dimension_numbers = #tpu.dot_dimension_numbers<[2], [2], [1], [1], [0, 0, 0, 1, 1, 1], [0], [0]>} : vector<2x8x8xbf16>, vector<2x8x8xbf16>, vector<2x8x8xf32> -> vector<2x8x8xf32>
    "tpu.trace_stop"() : () -> ()
    %cst_22 = arith.constant dense<0xFF800000> : vector<2x8xf32>
    %65 = vector.multi_reduction <maximumf>, %64, %cst_22 [2] : vector<2x8x8xf32> to vector<2x8xf32>
    %66 = vector.shape_cast %65 : vector<2x8xf32> to vector<2x8x1xf32>
    %67 = vector.broadcast %66 : vector<2x8x1xf32> to vector<2x8x8xf32>
    %68 = arith.subf %64, %67 : vector<2x8x8xf32>
    %69 = math.exp %68 : vector<2x8x8xf32>
    %cst_23 = arith.constant dense<0.000000e+00> : vector<2x8xf32>
    %70 = vector.multi_reduction <add>, %69, %cst_23 [2] : vector<2x8x8xf32> to vector<2x8xf32>
    %71 = vector.shape_cast %70 : vector<2x8xf32> to vector<2x8x1xf32>
    %72 = tpu.reciprocal %71 {approx = true} : vector<2x8x1xf32> -> vector<2x8x1xf32>
    %73 = vector.broadcast %72 : vector<2x8x1xf32> to vector<2x8x8xf32>
    %74 = arith.mulf %69, %73 : vector<2x8x8xf32>
    %75 = arith.truncf %74 : vector<2x8x8xf32> to vector<2x8x8xbf16>
    "tpu.trace_start"() <{level = 10 : i32, message = "bqk,bkd->bqd"}> : () -> ()
    %cst_24 = arith.constant dense<0.000000e+00> : vector<2x8x8xf32>
    %76 = tpu.matmul %75, %63, %cst_24 {dimension_numbers = #tpu.dot_dimension_numbers<[2], [1], [1], [2], [0, 0, 0, 1, 1, 2], [0], [0]>} : vector<2x8x8xbf16>, vector<2x8x8xbf16>, vector<2x8x8xf32> -> vector<2x8x8xf32>
    "tpu.trace_stop"() : () -> ()
    %77 = vector.extract_strided_slice %40 {offsets = [0, 0, 16], sizes = [2, 8, 8], strides = [1, 1, 1]} : vector<2x8x32xbf16> to vector<2x8x8xbf16>
    %78 = vector.extract_strided_slice %42 {offsets = [0, 0, 16], sizes = [2, 8, 8], strides = [1, 1, 1]} : vector<2x8x32xbf16> to vector<2x8x8xbf16>
    %79 = vector.extract_strided_slice %44 {offsets = [0, 0, 16], sizes = [2, 8, 8], strides = [1, 1, 1]} : vector<2x8x32xbf16> to vector<2x8x8xbf16>
    "tpu.trace_start"() <{level = 10 : i32, message = "bqd,bkd->bqk"}> : () -> ()
    %cst_25 = arith.constant dense<0.000000e+00> : vector<2x8x8xf32>
    %80 = tpu.matmul %77, %78, %cst_25 {dimension_numbers = #tpu.dot_dimension_numbers<[2], [2], [1], [1], [0, 0, 0, 1, 1, 1], [0], [0]>} : vector<2x8x8xbf16>, vector<2x8x8xbf16>, vector<2x8x8xf32> -> vector<2x8x8xf32>
    "tpu.trace_stop"() : () -> ()
    %cst_26 = arith.constant dense<0xFF800000> : vector<2x8xf32>
    %81 = vector.multi_reduction <maximumf>, %80, %cst_26 [2] : vector<2x8x8xf32> to vector<2x8xf32>
    %82 = vector.shape_cast %81 : vector<2x8xf32> to vector<2x8x1xf32>
    %83 = vector.broadcast %82 : vector<2x8x1xf32> to vector<2x8x8xf32>
    %84 = arith.subf %80, %83 : vector<2x8x8xf32>
    %85 = math.exp %84 : vector<2x8x8xf32>
    %cst_27 = arith.constant dense<0.000000e+00> : vector<2x8xf32>
    %86 = vector.multi_reduction <add>, %85, %cst_27 [2] : vector<2x8x8xf32> to vector<2x8xf32>
    %87 = vector.shape_cast %86 : vector<2x8xf32> to vector<2x8x1xf32>
    %88 = tpu.reciprocal %87 {approx = true} : vector<2x8x1xf32> -> vector<2x8x1xf32>
    %89 = vector.broadcast %88 : vector<2x8x1xf32> to vector<2x8x8xf32>
    %90 = arith.mulf %85, %89 : vector<2x8x8xf32>
    %91 = arith.truncf %90 : vector<2x8x8xf32> to vector<2x8x8xbf16>
    "tpu.trace_start"() <{level = 10 : i32, message = "bqk,bkd->bqd"}> : () -> ()
    %cst_28 = arith.constant dense<0.000000e+00> : vector<2x8x8xf32>
    %92 = tpu.matmul %91, %79, %cst_28 {dimension_numbers = #tpu.dot_dimension_numbers<[2], [1], [1], [2], [0, 0, 0, 1, 1, 2], [0], [0]>} : vector<2x8x8xbf16>, vector<2x8x8xbf16>, vector<2x8x8xf32> -> vector<2x8x8xf32>
    "tpu.trace_stop"() : () -> ()
    %93 = vector.extract_strided_slice %40 {offsets = [0, 0, 24], sizes = [2, 8, 8], strides = [1, 1, 1]} : vector<2x8x32xbf16> to vector<2x8x8xbf16>
    %94 = vector.extract_strided_slice %42 {offsets = [0, 0, 24], sizes = [2, 8, 8], strides = [1, 1, 1]} : vector<2x8x32xbf16> to vector<2x8x8xbf16>
    %95 = vector.extract_strided_slice %44 {offsets = [0, 0, 24], sizes = [2, 8, 8], strides = [1, 1, 1]} : vector<2x8x32xbf16> to vector<2x8x8xbf16>
    "tpu.trace_start"() <{level = 10 : i32, message = "bqd,bkd->bqk"}> : () -> ()
    %cst_29 = arith.constant dense<0.000000e+00> : vector<2x8x8xf32>
    %96 = tpu.matmul %93, %94, %cst_29 {dimension_numbers = #tpu.dot_dimension_numbers<[2], [2], [1], [1], [0, 0, 0, 1, 1, 1], [0], [0]>} : vector<2x8x8xbf16>, vector<2x8x8xbf16>, vector<2x8x8xf32> -> vector<2x8x8xf32>
    "tpu.trace_stop"() : () -> ()
    %cst_30 = arith.constant dense<0xFF800000> : vector<2x8xf32>
    %97 = vector.multi_reduction <maximumf>, %96, %cst_30 [2] : vector<2x8x8xf32> to vector<2x8xf32>
    %98 = vector.shape_cast %97 : vector<2x8xf32> to vector<2x8x1xf32>
    %99 = vector.broadcast %98 : vector<2x8x1xf32> to vector<2x8x8xf32>
    %100 = arith.subf %96, %99 : vector<2x8x8xf32>
    %101 = math.exp %100 : vector<2x8x8xf32>
    %cst_31 = arith.constant dense<0.000000e+00> : vector<2x8xf32>
    %102 = vector.multi_reduction <add>, %101, %cst_31 [2] : vector<2x8x8xf32> to vector<2x8xf32>
    %103 = vector.shape_cast %102 : vector<2x8xf32> to vector<2x8x1xf32>
    %104 = tpu.reciprocal %103 {approx = true} : vector<2x8x1xf32> -> vector<2x8x1xf32>
    %105 = vector.broadcast %104 : vector<2x8x1xf32> to vector<2x8x8xf32>
    %106 = arith.mulf %101, %105 : vector<2x8x8xf32>
    %107 = arith.truncf %106 : vector<2x8x8xf32> to vector<2x8x8xbf16>
    "tpu.trace_start"() <{level = 10 : i32, message = "bqk,bkd->bqd"}> : () -> ()
    %cst_32 = arith.constant dense<0.000000e+00> : vector<2x8x8xf32>
    %108 = tpu.matmul %107, %95, %cst_32 {dimension_numbers = #tpu.dot_dimension_numbers<[2], [1], [1], [2], [0, 0, 0, 1, 1, 2], [0], [0]>} : vector<2x8x8xbf16>, vector<2x8x8xbf16>, vector<2x8x8xf32> -> vector<2x8x8xf32>
    "tpu.trace_stop"() : () -> ()
    %109 = tpu.concatenate %60, %76, %92, %108 in 2 : vector<2x8x8xf32>, vector<2x8x8xf32>, vector<2x8x8xf32>, vector<2x8x8xf32> -> vector<2x8x32xf32>
    %110 = vector.shape_cast %109 : vector<2x8x32xf32> to vector<16x32xf32>
    %111 = arith.truncf %110 : vector<16x32xf32> to vector<16x32xbf16>
    %c0_33 = arith.constant 0 : index
    %c0_34 = arith.constant 0 : index
    %c0_35 = arith.constant 0 : index
    %112 = vector.load %arg6[%c0_33, %c0_34, %c0_35] : memref<1x32x32xbf16, #tpu.memory_space<vmem>>, vector<1x32x32xbf16>
    %113 = vector.shape_cast %112 : vector<1x32x32xbf16> to vector<32x32xbf16>
    %cst_36 = arith.constant dense<0.000000e+00> : vector<16x32xf32>
    %114 = tpu.matmul %111, %113, %cst_36 {dimension_numbers = #tpu.dot_dimension_numbers<[1], [0], [0], [1], [0, 0, 1, 1], [], []>} : vector<16x32xbf16>, vector<32x32xbf16>, vector<16x32xf32> -> vector<16x32xf32>
    %115 = arith.addf %3, %114 : vector<16x32xf32>
    %c0_37 = arith.constant 0 : index
    %c0_38 = arith.constant 0 : index
    %c0_39 = arith.constant 0 : index
    %116 = vector.load %arg7[%c0_37, %c0_38, %c0_39] : memref<1x1x32xf32, #tpu.memory_space<vmem>>, vector<1x1x32xf32>
    %117 = vector.shape_cast %116 : vector<1x1x32xf32> to vector<1x32xf32>
    %118 = vector.broadcast %117 : vector<1x32xf32> to vector<16x32xf32>
    %119 = arith.addf %115, %118 : vector<16x32xf32>
    %c0_40 = arith.constant 0 : index
    %c0_41 = arith.constant 0 : index
    %c0_42 = arith.constant 0 : index
    %120 = vector.load %arg8[%c0_40, %c0_41, %c0_42] : memref<1x1x32xf32, #tpu.memory_space<vmem>>, vector<1x1x32xf32>
    %121 = vector.shape_cast %120 : vector<1x1x32xf32> to vector<1x32xf32>
    %c0_43 = arith.constant 0 : index
    %c0_44 = arith.constant 0 : index
    %c0_45 = arith.constant 0 : index
    %122 = vector.load %arg9[%c0_43, %c0_44, %c0_45] : memref<1x1x32xf32, #tpu.memory_space<vmem>>, vector<1x1x32xf32>
    %123 = vector.shape_cast %122 : vector<1x1x32xf32> to vector<1x32xf32>
    %cst_46 = arith.constant dense<0.000000e+00> : vector<16xf32>
    %124 = vector.multi_reduction <add>, %119, %cst_46 [1] : vector<16x32xf32> to vector<16xf32>
    %125 = vector.shape_cast %124 : vector<16xf32> to vector<16x1xf32>
    %cst_47 = arith.constant 3.200000e+01 : f32
    %126 = vector.broadcast %cst_47 : f32 to vector<16x1xf32>
    %127 = arith.divf %125, %126 : vector<16x1xf32>
    %128 = vector.broadcast %127 : vector<16x1xf32> to vector<16x32xf32>
    %129 = arith.subf %119, %128 : vector<16x32xf32>
    %130 = arith.mulf %129, %129 : vector<16x32xf32>
    %cst_48 = arith.constant dense<0.000000e+00> : vector<16xf32>
    %131 = vector.multi_reduction <add>, %130, %cst_48 [1] : vector<16x32xf32> to vector<16xf32>
    %132 = vector.shape_cast %131 : vector<16xf32> to vector<16x1xf32>
    %cst_49 = arith.constant 3.200000e+01 : f32
    %133 = vector.broadcast %cst_49 : f32 to vector<16x1xf32>
    %134 = arith.divf %132, %133 : vector<16x1xf32>
    %135 = vector.broadcast %127 : vector<16x1xf32> to vector<16x32xf32>
    %136 = arith.subf %119, %135 : vector<16x32xf32>
    %cst_50 = arith.constant 9.99999974E-6 : f32
    %137 = vector.broadcast %cst_50 : f32 to vector<16x1xf32>
    %138 = arith.addf %134, %137 : vector<16x1xf32>
    %139 = math.rsqrt %138 : vector<16x1xf32>
    %140 = vector.broadcast %139 : vector<16x1xf32> to vector<16x32xf32>
    %141 = arith.mulf %136, %140 : vector<16x32xf32>
    %142 = vector.broadcast %121 : vector<1x32xf32> to vector<16x32xf32>
    %143 = arith.mulf %141, %142 : vector<16x32xf32>
    %144 = vector.broadcast %123 : vector<1x32xf32> to vector<16x32xf32>
    %145 = arith.addf %143, %144 : vector<16x32xf32>
    %146 = arith.truncf %145 : vector<16x32xf32> to vector<16x32xbf16>
    %c0_51 = arith.constant 0 : index
    %c0_52 = arith.constant 0 : index
    %c0_53 = arith.constant 0 : index
    %147 = vector.load %arg10[%c0_51, %c0_52, %c0_53] : memref<1x32x64xbf16, #tpu.memory_space<vmem>>, vector<1x32x64xbf16>
    %148 = vector.shape_cast %147 : vector<1x32x64xbf16> to vector<32x64xbf16>
    %cst_54 = arith.constant dense<0.000000e+00> : vector<16x64xf32>
    %149 = tpu.matmul %146, %148, %cst_54 {dimension_numbers = #tpu.dot_dimension_numbers<[1], [0], [0], [1], [0, 0, 1, 1], [], []>} : vector<16x32xbf16>, vector<32x64xbf16>, vector<16x64xf32> -> vector<16x64xf32>
    %c0_55 = arith.constant 0 : index
    %c0_56 = arith.constant 0 : index
    %c0_57 = arith.constant 0 : index
    %150 = vector.load %arg11[%c0_55, %c0_56, %c0_57] : memref<1x1x64xf32, #tpu.memory_space<vmem>>, vector<1x1x64xf32>
    %151 = vector.shape_cast %150 : vector<1x1x64xf32> to vector<1x64xf32>
    %152 = vector.broadcast %151 : vector<1x64xf32> to vector<16x64xf32>
    %153 = arith.addf %149, %152 : vector<16x64xf32>
    %cst_58 = arith.constant 5.000000e-01 : f32
    %154 = vector.broadcast %cst_58 : f32 to vector<16x64xf32>
    %155 = arith.mulf %154, %153 : vector<16x64xf32>
    %cst_59 = arith.constant 0.707106769 : f32
    %156 = vector.broadcast %cst_59 : f32 to vector<16x64xf32>
    %157 = arith.mulf %153, %156 : vector<16x64xf32>
    %158 = math.erf %157 : vector<16x64xf32>
    %cst_60 = arith.constant 1.000000e+00 : f32
    %159 = vector.broadcast %cst_60 : f32 to vector<16x64xf32>
    %160 = arith.addf %159, %158 : vector<16x64xf32>
    %161 = arith.mulf %155, %160 : vector<16x64xf32>
    %162 = arith.truncf %161 : vector<16x64xf32> to vector<16x64xbf16>
    %c0_61 = arith.constant 0 : index
    %c0_62 = arith.constant 0 : index
    %c0_63 = arith.constant 0 : index
    %163 = vector.load %arg12[%c0_61, %c0_62, %c0_63] : memref<1x64x32xbf16, #tpu.memory_space<vmem>>, vector<1x64x32xbf16>
    %164 = vector.shape_cast %163 : vector<1x64x32xbf16> to vector<64x32xbf16>
    %cst_64 = arith.constant dense<0.000000e+00> : vector<16x32xf32>
    %165 = tpu.matmul %162, %164, %cst_64 {dimension_numbers = #tpu.dot_dimension_numbers<[1], [0], [0], [1], [0, 0, 1, 1], [], []>} : vector<16x64xbf16>, vector<64x32xbf16>, vector<16x32xf32> -> vector<16x32xf32>
    %c0_65 = arith.constant 0 : index
    %c0_66 = arith.constant 0 : index
    %c0_67 = arith.constant 0 : index
    %166 = vector.load %arg13[%c0_65, %c0_66, %c0_67] : memref<1x1x32xf32, #tpu.memory_space<vmem>>, vector<1x1x32xf32>
    %167 = vector.shape_cast %166 : vector<1x1x32xf32> to vector<1x32xf32>
    %168 = vector.broadcast %167 : vector<1x32xf32> to vector<16x32xf32>
    %169 = arith.addf %165, %168 : vector<16x32xf32>
    %170 = arith.addf %119, %169 : vector<16x32xf32>
    %c0_68 = arith.constant 0 : index
    %c0_69 = arith.constant 0 : index
    %171 = vector.load %arg14[%c0_68, %c0_69] : memref<16x32xf32, #tpu.memory_space<vmem>>, vector<16x32xf32>
    tpu.vector_store %arg14[%c0_68, %c0_69], %170 {strides = array<i32>} : memref<16x32xf32, #tpu.memory_space<vmem>>, vector<16x32xf32>,
    return
  }
  func.func @transform_0(%arg0: i32, %arg1: i32) -> (i32, i32) {
    %c0_i32 = arith.constant 0 : i32
    %c0_i32_0 = arith.constant 0 : i32
    return %arg0, %c0_i32 : i32, i32
  }
  func.func @transform_1(%arg0: i32, %arg1: i32) -> (i32, i32, i32) {
    %c0_i32 = arith.constant 0 : i32
    %c0_i32_0 = arith.constant 0 : i32
    %c0_i32_1 = arith.constant 0 : i32
    return %arg1, %c0_i32, %c0_i32_0 : i32, i32, i32
  }
  func.func @transform_2(%arg0: i32, %arg1: i32) -> (i32, i32, i32) {
    %c0_i32 = arith.constant 0 : i32
    %c0_i32_0 = arith.constant 0 : i32
    %c0_i32_1 = arith.constant 0 : i32
    return %arg1, %c0_i32, %c0_i32_0 : i32, i32, i32
  }
  func.func @transform_3(%arg0: i32, %arg1: i32) -> (i32, i32, i32) {
    %c0_i32 = arith.constant 0 : i32
    %c0_i32_0 = arith.constant 0 : i32
    %c0_i32_1 = arith.constant 0 : i32
    return %arg1, %c0_i32, %c0_i32_0 : i32, i32, i32
  }
  func.func @transform_4(%arg0: i32, %arg1: i32) -> (i32, i32, i32) {
    %c0_i32 = arith.constant 0 : i32
    %c0_i32_0 = arith.constant 0 : i32
    %c0_i32_1 = arith.constant 0 : i32
    return %arg1, %c0_i32, %c0_i32_0 : i32, i32, i32
  }
  func.func @transform_5(%arg0: i32, %arg1: i32) -> (i32, i32, i32) {
    %c0_i32 = arith.constant 0 : i32
    %c0_i32_0 = arith.constant 0 : i32
    %c0_i32_1 = arith.constant 0 : i32
    return %arg1, %c0_i32, %c0_i32_0 : i32, i32, i32
  }
  func.func @transform_6(%arg0: i32, %arg1: i32) -> (i32, i32, i32) {
    %c0_i32 = arith.constant 0 : i32
    %c0_i32_0 = arith.constant 0 : i32
    %c0_i32_1 = arith.constant 0 : i32
    return %arg1, %c0_i32, %c0_i32_0 : i32, i32, i32
  }
  func.func @transform_7(%arg0: i32, %arg1: i32) -> (i32, i32, i32) {
    %c0_i32 = arith.constant 0 : i32
    %c0_i32_0 = arith.constant 0 : i32
    %c0_i32_1 = arith.constant 0 : i32
    return %arg1, %c0_i32, %c0_i32_0 : i32, i32, i32
  }
  func.func @transform_8(%arg0: i32, %arg1: i32) -> (i32, i32, i32) {
    %c0_i32 = arith.constant 0 : i32
    %c0_i32_0 = arith.constant 0 : i32
    %c0_i32_1 = arith.constant 0 : i32
    return %arg1, %c0_i32, %c0_i32_0 : i32, i32, i32
  }
  func.func @transform_9(%arg0: i32, %arg1: i32) -> (i32, i32, i32) {
    %c0_i32 = arith.constant 0 : i32
    %c0_i32_0 = arith.constant 0 : i32
    %c0_i32_1 = arith.constant 0 : i32
    return %arg1, %c0_i32, %c0_i32_0 : i32, i32, i32
  }
  func.func @transform_10(%arg0: i32, %arg1: i32) -> (i32, i32, i32) {
    %c0_i32 = arith.constant 0 : i32
    %c0_i32_0 = arith.constant 0 : i32
    %c0_i32_1 = arith.constant 0 : i32
    return %arg1, %c0_i32, %c0_i32_0 : i32, i32, i32
  }
  func.func @transform_11(%arg0: i32, %arg1: i32) -> (i32, i32, i32) {
    %c0_i32 = arith.constant 0 : i32
    %c0_i32_0 = arith.constant 0 : i32
    %c0_i32_1 = arith.constant 0 : i32
    return %arg1, %c0_i32, %c0_i32_0 : i32, i32, i32
  }
  func.func @transform_12(%arg0: i32, %arg1: i32) -> (i32, i32) {
    %c0_i32 = arith.constant 0 : i32
    %c0_i32_0 = arith.constant 0 : i32
    return %arg0, %c0_i32 : i32, i32
  }
}

</mosaic_0001>

<bundles_post_ra>
// kernel: tpu_custom_call.1
= control target key start
LH: loop header
LB: loop body
LE: loop exit
PB: predicated region body
PF: predicated region fallthrough
CT: control target
= control target key end

     0   :  { %s3510_s0 = inlined_call_operand.hbm [shape: f32[16,32], index: 0, kind: input, shape index: {}]   ;;  %s3511_s1 = inlined_call_operand.vmem [shape: f32[2,1,32], index: 1, kind: input, shape index: {}]   ;;  %s3512_s2 = inlined_call_operand.vmem [shape: f32[2,1,32], index: 2, kind: input, shape index: {}]   ;;  %s3513_s3 = inlined_call_operand.vmem [shape: bf16[2,32,96], index: 3, kind: input, shape index: {}]   ;;  %s3514_s4 = inlined_call_operand.vmem [shape: bf16[2,32,32], index: 4, kind: input, shape index: {}]   ;;  %s3515_s5 = inlined_call_operand.hbm [shape: f32[2,1,32], index: 5, kind: input, shape index: {}]   ;;  %s3516_s6 = inlined_call_operand.hbm [shape: f32[2,1,32], index: 6, kind: input, shape index: {}]   ;;  %s3517_s7 = inlined_call_operand.hbm [shape: f32[2,1,32], index: 7, kind: input, shape index: {}]   ;;  %s3518_s8 = inlined_call_operand.vmem [shape: bf16[2,32,64], index: 8, kind: input, shape index: {}]   ;;  %s3519_s9 = inlined_call_operand.hbm [shape: f32[2,1,64], index: 9, kind: input, shape index: {}]   ;;  %s3520_s10 = inlined_call_operand.vmem [shape: bf16[2,64,32], index: 10, kind: input, shape index: {}]   ;;  %s3521_s11 = inlined_call_operand.vmem [shape: f32[2,1,32], index: 11, kind: input, shape index: {}]   ;;  %s3522_s12 = inlined_call_operand.hbm [shape: f32[16,32], index: 12, kind: output, shape index: {}]  }
   0x1   :  { %3536 = sst [smem:[#allocation21_spill]] %s3514_s4 }
   0x2   :  { %3537 = sst [smem:[#allocation22_spill]] %s3515_s5 }
   0x3   :  { %3538 = sst [smem:[#allocation23_spill]] %s3517_s7 }
   0x4   :  { %3539 = sst [smem:[#allocation24_spill]] %s3518_s8 }
   0x5   :  { %3540 = sst [smem:[#allocation25_spill]] %s3520_s10 }
   0x6   :  { %3541 = sst [smem:[#allocation26_spill]] %s3521_s11 }
   0x7   :  { %3542 = sst [smem:[#allocation27_spill]] %s3522_s12 }
   0x8   :  { %17 = vsyncpa [#allocation3], 0 }
   0x9   :  { %18 = vsyncpa [#allocation6], 0 }
   0xa   :  { %20 = vsyncpa [#allocation6 + $0x1], 0 }
   0xb   :  { %21 = vsyncpa [#allocation9], 0 }
   0xc   :  { %23 = vsyncpa [#allocation9 + $0x1], 0 }
   0xd   :  { %24 = vsyncpa [#allocation4], 0  ;;  %s2955_s21 = smov 0   ;;  %s2957_s22 = smov 0  }
   0xe   :  { %s2959_s23 = smov 0   ;;  %s2961_s24 = smov 0  }
   0xf   :  { %s2963_s25 = smov 0   ;;  %s2965_s26 = smov 0  }
  0x10 LB: > { %3543 = sst [smem:[#allocation16_spill]] %s2851_s23  ;;  %s39_s27 = sadd.s32 1, %s2859_s25  ;;  %s2863_s26 = sphi %s2965_s26, %s30_s26   ;;  %s2859_s25 = sphi %s2963_s25, %s3579_s25   ;;  %s2855_s24 = sphi %s2961_s24, %s3578_s24   ;;  %s2851_s23 = sphi %s2959_s23, %s3577_s23   ;;  %s2847_s22 = sphi %s2957_s22, %s3581_s22   ;;  %s2843_s21 = sphi %s2955_s21, %s3580_s21  }
  0x11   : > { %3544 = sst [smem:[#allocation17_spill]] %s2859_s25  ;;  %s179_s28 = sadd.s32 1, %s2851_s23 }
  0x12   : > { %3545 = sst [smem:[#allocation18_spill]] %s2863_s26  ;;  %p40_p0 = scmp.ge.s32.totalorder %s39_s27, 2 }
  0x13   : > { %p186_p1 = scmp.ne.s32.totalorder %s2851_s23, %s2847_s22  ;;  %p187_p2 = scmp.eq.s32.totalorder %s2863_s26, 0 }
  0x14   : > { %s3583_s27 = smov (%p40_p0, %s39_s27), 0  ;;  %p2485_p4 = scmp.lt.s32.totalorder %s2863_s26, 2 }
  0x15   : > { %3546 = sst [smem:[#allocation19_spill]] %s3583_s27  ;;  %p188_p3 = por %p187_p2, %p186_p1 }
  0x16   : > { %s176_s29 = ssub.s32 %s2859_s25, %s3583_s27  ;;  %s3526_s30 = sand.u32 1, %s2863_s26  }
  0x17   : > { %p177_p5 = scmp.eq.s32.totalorder %s176_s29, 0  ;;  %s2997_s13 = sand.u32 1, %s2851_s23  }
  0x18   : > { %s3000_s14 = sshll.u32 %s2859_s25, 4  ;;  %s3548_s5 = sld [smem:[#allocation22_spill]] }
  0x19   : > { %s3003_s15 = scalar_select %p177_p5, %s2851_s23, %s179_s28  }
  0x1a   : > { %s445_s19 = scalar_lea.vmem [#allocation5], %s2997_s13  ;;  %p3012_p6 = pnand %p2485_p4, %p188_p3 }
  0x1b   : > { %3547 = sst [smem:[#allocation20_spill]] %s3003_s15  ;;  %s452_s20 = sshll.u32 %s445_s19, 4  ;;  %s3016_s20 = int_to_ptr.vmem [resolvable:$true] %s452_s20 }
  0x1c   : > { %s3549_s29 = scalar_select %p3012_p6, 1, 0 }
  0x1d   : > { %s3020_s28 = scalar_lea.sflag [#allocation6], %s3526_s30  ;;  %p3026_p8 = pneg %p3012_p6 }
  0x1e   : > { %s3009_s18 = scalar_lea.hbm %s3548_s5, %s3000_s14  ;;  %s2632_s25 = scalar_lea.hbm %s3548_s5, 32 }
  0x1f   : > { %s2627_s27 = scalar_lea.hbm %s3009_s18, 16  ;;  %p2633_p11 = scmp.lt.u32.totalorder %s3009_s18, %s3548_s5 }
  0x20   : > { %p2628_p7 = scmp.ne.s32.totalorder %s3009_s18, %s2627_s27  ;;  %p2634_p12 = scmp.lt.u32.totalorder %s2632_s25, %s2627_s27 }
  0x21   : > { %s3550_s16 = scalar_select %p3026_p8, 1, 0 }
  0x22   : > { %p2630_p9 = pnand %p3026_p8, %p2628_p7  ;;  %p2635_p13 = por %p2634_p12, %p2633_p11 }
  0x23   : > { %p2636_p0 = scmp.lt.u32.totalorder %s2627_s27, %s3009_s18 }
  0x24   : > { %p2631_p10 = pneg %p2630_p9 }
  0x25   : > { %p2637_p1 = por %p2636_p0, %p2635_p13 }
  0x27   : > { %p2638_p2 = pnand %p2637_p1, %p2631_p10 }
  0x29   : > { %2641 = shalt.err (!%p2638_p2)
}
  0x2a   : > { %s2642_s30 = scalar_lea.vmem %s3016_s20, 16  ;;  %s2865_s17 = smov [#allocation5]  }
  0x2b   : > { %p2643_p3 = scmp.ne.s32.totalorder %s3016_s20, %s2642_s30  ;;  %s2647_s19 = sshll.u32 %s2865_s17, 4  ;;  %s2648_s19 = int_to_ptr.vmem [resolvable:$false] %s2647_s19 }
  0x2c   : > { %s2649_s23 = scalar_lea.vmem %s2648_s19, 32  ;;  %p2650_p7 = scmp.lt.s32.totalorder %s3016_s20, %s2648_s19 }
  0x2d   : > { %p2645_p4 = pnand %p2643_p3, %p3026_p8  ;;  %p2651_p9 = scmp.lt.s32.totalorder %s2649_s23, %s2642_s30 }
  0x2f   : > { %p2646_p5 = pneg %p2645_p4  ;;  %p2652_p11 = por %p2651_p9, %p2650_p7 }
  0x31   : > { %p2653_p12 = pnand %p2652_p11, %p2646_p5 }
  0x33   : > { %2656 = shalt.err (!%p2653_p12)
}
  0x34   : > { %2474 = dma.hbm_to_vmem [thread:$0]  (!%p3012_p6), %s3009_s18, 16, %s3016_s20, %s3020_s28  }
  0x35   : > { %s3551_s7 = sld [smem:[#allocation23_spill]]  ;;  %s479_s30 = scalar_lea.vmem [#allocation8], %s2997_s13 }
  0x36   : > { %s486_s17 = sshll.u32 %s479_s30, 4  ;;  %s3552_s19 = sand.u32 1, %s2863_s26   ;;  %s487_s17 = int_to_ptr.vmem [resolvable:$true] %s486_s17 }
  0x37   : > { %s3059_s23 = scalar_lea.sflag [#allocation9], %s3552_s19 }
  0x3b   : > { %s3054_s15 = scalar_lea.hbm %s3551_s7, %s3000_s14  ;;  %s2662_s25 = scalar_lea.hbm %s3551_s7, 32 }
  0x3c   : > { %s2657_s5 = scalar_lea.hbm %s3054_s15, 16  ;;  %p2663_p1 = scmp.lt.u32.totalorder %s3054_s15, %s3551_s7 }
  0x3d   : > { %p2658_p10 = scmp.ne.s32.totalorder %s3054_s15, %s2657_s5  ;;  %p2664_p2 = scmp.lt.u32.totalorder %s2662_s25, %s2657_s5 }
  0x3e   : > { %p2666_p4 = scmp.lt.u32.totalorder %s2657_s5, %s3054_s15 }
  0x3f   : > { %p2660_p13 = pnand %p2658_p10, %p3026_p8  ;;  %p2665_p3 = por %p2664_p2, %p2663_p1 }
  0x41   : > { %p2661_p0 = pneg %p2660_p13  ;;  %p2667_p5 = por %p2666_p4, %p2665_p3 }
  0x43   : > { %p2668_p7 = pnand %p2667_p5, %p2661_p0 }
  0x45   : > { %2671 = shalt.err (!%p2668_p7)
}
  0x46   : > { %s2672_s30 = scalar_lea.vmem %s487_s17, 16  ;;  %s2866_s19 = smov [#allocation8]  }
  0x47   : > { %p2673_p9 = scmp.ne.s32.totalorder %s487_s17, %s2672_s30  ;;  %s2677_s11 = sshll.u32 %s2866_s19, 4  ;;  %s2678_s11 = int_to_ptr.vmem [resolvable:$false] %s2677_s11 }
  0x48   : > { %s2679_s18 = scalar_lea.vmem %s2678_s11, 32  ;;  %p2680_p10 = scmp.lt.s32.totalorder %s487_s17, %s2678_s11 }
  0x49   : > { %p2675_p11 = pnand %p2673_p9, %p3026_p8  ;;  %p2681_p13 = scmp.lt.s32.totalorder %s2679_s18, %s2672_s30 }
  0x4b   : > { %p2676_p12 = pneg %p2675_p11  ;;  %p2682_p6 = por %p2681_p13, %p2680_p10 }
  0x4d   : > { %p2683_p1 = pnand %p2682_p6, %p2676_p12 }
  0x4f   : > { %2686 = shalt.err (!%p2683_p1)
}
  0x50   : > { %p3553_p2 = scmp.ne.s32.totalorder %s3549_s29, 0  ;;  %s3080_s5 = sadd.s32 4294967295, %s2863_s26  }
  0x51   : > { %p192_p0 = scmp.ne.s32.totalorder %s2847_s22, %s2843_s21  ;;  %p3531_p6 = scmp.eq.s32.totalorder %s3080_s5, 0 }
  0x52   : > { %2480 = dma.hbm_to_vmem [thread:$0]  (!%p3553_p2), %s3054_s15, 16, %s487_s17, %s3059_s23  }
  0x53   : > { %p2210_p3 = scmp.ge.s32.totalorder %s2863_s26, 1  ;;  %p385_p4 = scmp.lt.s32.totalorder %s2863_s26, 3 }
  0x54   : > { %p3089_p5 = por %p3531_p6, %p192_p0  ;;  %s2867_s15 = smov [#allocation2]  }
  0x55   : > { %p3093_p7 = pnand %p2210_p3, %p385_p4  ;;  %s400_s17 = sshll.u32 %s2867_s15, 4  ;;  %s401_s17 = int_to_ptr.vmem [resolvable:$true] %s400_s17 }
  0x56   : > { %s3554_s11 = scalar_select %p3089_p5, 1, 0 }
  0x57   : > { %s3555_s12 = scalar_select %p3093_p7, 1, 0 }
  0x58   : > { %p2467_p9 = pneg %p3093_p7  ;;  %s3109_s27 = scalar_lea.hbm %s3516_s6, %s3000_s14 }
  0x59   : > { %s462_s30 = scalar_lea.vmem [#allocation7], %s2997_s13  ;;  %s2687_s7 = scalar_lea.hbm %s3510_s0, 256 }
  0x5a   : > { %p3101_p11 = pnand %p2467_p9, %p3531_p6  ;;  %s469_s19 = sshll.u32 %s462_s30, 4  ;;  %s3112_s19 = int_to_ptr.vmem [resolvable:$true] %s469_s19 }
  0x5b   : > { %p2688_p12 = scmp.ne.s32.totalorder %s3510_s0, %s2687_s7  ;;  %p2694_p0 = scmp.lt.u32.totalorder %s2687_s7, %s3510_s0 }
  0x5c   : > { %p2689_p10 = pneg %p3101_p11 }
  0x5e   : > { %p2690_p13 = pnand %p2689_p10, %p2688_p12 }
  0x60   : > { %p2691_p1 = pneg %p2690_p13 }
  0x62   : > { %p2696_p3 = pnand %p2694_p0, %p2691_p1 }
  0x64   : > { %2699 = shalt.err (!%p2696_p3)
}
  0x65   : > { %s2700_s30 = scalar_lea.vmem %s401_s17, 256  ;;  %p2708_p5 = scmp.lt.s32.totalorder %s401_s17, %s401_s17 }
  0x66   : > { %p2701_p4 = scmp.ne.s32.totalorder %s401_s17, %s2700_s30  ;;  %p2709_p7 = scmp.lt.s32.totalorder %s2700_s30, %s2700_s30 }
  0x68   : > { %p2703_p9 = pnand %p2701_p4, %p2689_p10  ;;  %p2710_p2 = por %p2709_p7, %p2708_p5 }
  0x6a   : > { %p2704_p6 = pneg %p2703_p9 }
  0x6c   : > { %p2711_p8 = pnand %p2710_p2, %p2704_p6 }
  0x6e   : > { %2714 = shalt.err (!%p2711_p8)
}
  0x6f   : > { %s2868_s10 = smov 128   ;;  %s2869_s26 = smov 8  }
  0x70   : > { %2470 = dma.hbm_to_vmem [thread:$0]  (!%p3101_p11), %s3510_s0, 256, %s401_s17, [#allocation3], %s2868_s10, %s2868_s10, %s2869_s26  }
  0x71   : > { %s2715_s15 = scalar_lea.hbm %s3109_s27, 16  ;;  %p3557_p10 = scmp.ne.s32.totalorder %s3550_s16, 0 }
  0x72   : > { %p2716_p12 = scmp.ne.s32.totalorder %s3109_s27, %s2715_s15  ;;  %s2720_s30 = scalar_lea.hbm %s3516_s6, 32 }
  0x73   : > { %p2721_p8 = scmp.lt.u32.totalorder %s3109_s27, %s3516_s6  ;;  %p2722_p2 = scmp.lt.u32.totalorder %s2720_s30, %s2715_s15 }
  0x74   : > { %p2718_p13 = pnand %p2716_p12, %p3557_p10  ;;  %p2724_p7 = scmp.lt.u32.totalorder %s2715_s15, %s3109_s27 }
  0x75   : > { %p2723_p6 = por %p2722_p2, %p2721_p8 }
  0x76   : > { %p2719_p5 = pneg %p2718_p13 }
  0x77   : > { %p2725_p1 = por %p2724_p7, %p2723_p6 }
  0x79   : > { %p2726_p0 = pnand %p2725_p1, %p2719_p5 }
  0x7b   : > { %2729 = shalt.err (!%p2726_p0)
}
  0x7c   : > { %s2730_s17 = scalar_lea.vmem %s3112_s19, 16  ;;  %s2870_s21 = smov [#allocation7]  }
  0x7d   : > { %p2731_p11 = scmp.ne.s32.totalorder %s3112_s19, %s2730_s17  ;;  %s2735_s10 = sshll.u32 %s2870_s21, 4  ;;  %s2736_s10 = int_to_ptr.vmem [resolvable:$false] %s2735_s10 }
  0x7e   : > { %s2737_s4 = scalar_lea.vmem %s2736_s10, 32  ;;  %p2738_p9 = scmp.lt.s32.totalorder %s3112_s19, %s2736_s10 }
  0x7f   : > { %p2733_p3 = pnand %p2731_p11, %p3557_p10  ;;  %p2739_p12 = scmp.lt.s32.totalorder %s2737_s4, %s2730_s17 }
  0x81   : > { %p2734_p4 = pneg %p2733_p3  ;;  %p2740_p13 = por %p2739_p12, %p2738_p9 }
  0x83   : > { %p2741_p8 = pnand %p2740_p13, %p2734_p4 }
  0x85   : > { %2744 = shalt.err (!%p2741_p8)
}
  0x86   : > { %p3558_p5 = scmp.ne.s32.totalorder %s3549_s29, 0  ;;  %s3156_s7 = scalar_lea.hbm %s3519_s9, %s3000_s14 }
  0x87   : > { %s504_s18 = scalar_lea.vmem [#allocation10], %s2997_s13  ;;  %s2745_s20 = scalar_lea.hbm %s3156_s7, 16 }
  0x88   : > { %2477 = dma.hbm_to_vmem [thread:$0]  (!%p3558_p5), %s3109_s27, 16, %s3112_s19, %s3020_s28  }
  0x89   : > { %s511_s15 = sshll.u32 %s504_s18, 4  ;;  %p2746_p2 = scmp.ne.s32.totalorder %s3156_s7, %s2745_s20  ;;  %s512_s15 = int_to_ptr.vmem [resolvable:$true] %s511_s15 }
  0x8a   : > { %s2750_s28 = scalar_lea.hbm %s3519_s9, 32  ;;  %p2751_p1 = scmp.lt.u32.totalorder %s3156_s7, %s3519_s9 }
  0x8b   : > { %p2748_p6 = pnand %p2746_p2, %p3557_p10  ;;  %p2752_p0 = scmp.lt.u32.totalorder %s2750_s28, %s2745_s20 }
  0x8c   : > { %p2754_p3 = scmp.lt.u32.totalorder %s2745_s20, %s3156_s7 }
  0x8d   : > { %p2749_p7 = pneg %p2748_p6  ;;  %p2753_p11 = por %p2752_p0, %p2751_p1 }
  0x8f   : > { %p2755_p4 = por %p2754_p3, %p2753_p11 }
  0x91   : > { %p2756_p9 = pnand %p2755_p4, %p2749_p7 }
  0x93   : > { %2759 = shalt.err (!%p2756_p9)
}
  0x94   : > { %s2760_s13 = scalar_lea.vmem %s512_s15, 16  ;;  %s2871_s14 = smov [#allocation10]  }
  0x95   : > { %p2761_p12 = scmp.ne.s32.totalorder %s512_s15, %s2760_s13  ;;  %s2765_s17 = sshll.u32 %s2871_s14, 4  ;;  %s2766_s17 = int_to_ptr.vmem [resolvable:$false] %s2765_s17 }
  0x96   : > { %s2767_s21 = scalar_lea.vmem %s2766_s17, 32  ;;  %p2768_p2 = scmp.lt.s32.totalorder %s512_s15, %s2766_s17 }
  0x97   : > { %p2763_p13 = pnand %p2761_p12, %p3557_p10  ;;  %p2769_p6 = scmp.lt.s32.totalorder %s2767_s21, %s2760_s13 }
  0x99   : > { %p2764_p8 = pneg %p2763_p13  ;;  %p2770_p5 = por %p2769_p6, %p2768_p2 }
  0x9b   : > { %p2771_p0 = pnand %p2770_p5, %p2764_p8 }
  0x9d   : > { %2774 = shalt.err (!%p2771_p0)
}
  0x9e   : > { %p3559_p1 = scmp.ne.s32.totalorder %s3549_s29, 0  ;;  %p3560_p7 = scmp.ne.s32.totalorder %s3555_s12, 0 }
  0x9f   : > { %p3561_p10 = scmp.eq.s32.totalorder (!%p3560_p7), %s3080_s5, 0 }
  0xa0   : > { %2483 = dma.hbm_to_vmem [thread:$0]  (!%p3559_p1), %s3156_s7, 16, %s512_s15, %s3059_s23  }
  0xa1   : > { %534 = sbr.rel (%p3560_p7) target bundleno = 4335 (0x10ef), region = 68 }
  0xa8   : > { %2826 = dma.done.wait (%p3561_p10), [#allocation3], 256   ;;  %p3562_p11 = pmov %p3561_p10 }
  0xa9   : > { %s540_s16 = sand.u32 1, %s3080_s5   ;;  %s3185_s10 = sand.u32 1, %s2847_s22  }
  0xaa   : > { %2828 = vsyncadd (%p3562_p11), [#allocation3], 4294967040  ;;  %s541_s29 = scalar_lea.sflag [#allocation6], %s540_s16  ;;  %p3563_p5 = scmp.ne.s32.totalorder %s3554_s11, 0 }
  0xac   : > { %2830 = dma.done.wait (%p3563_p5), %s541_s29, 32  }
  0xad   : > { %2832 = vsyncadd (%p3563_p5), %s541_s29, 4294967264  ;;  %s557_s12 = scalar_lea.sflag [#allocation9], %s540_s16 }
  0xae   : > { %2834 = dma.done.wait (%p3563_p5), %s557_s12, 32  }
  0xaf   : > { %2836 = vsyncadd (%p3563_p5), %s557_s12, 4294967264  ;;  %p644_p3 = scmp.lt.s32.totalorder %s2855_s24, 1  ;;  %s3564_s21 = sld [smem:[#allocation21_spill]] }
  0xb0   : > { %s3565_s7 = sld [smem:[#allocation24_spill]]  ;;  %s3566_s25 = sld [smem:[#allocation25_spill]] }
  0xb1   : > { %s3200_s26 = scalar_select %p644_p3, %s2855_s24, 1 }
  0xb2   : > { %s3567_s27 = sld [smem:[#allocation26_spill]]  ;;  %s567_s15 = scalar_lea.vmem [#allocation10], %s3185_s10 }
  0xb3   : > { %s2269_s30 = sshll.u32 %s3200_s26, 4  ;;  %s2272_s28 = sshll.u32 %s3200_s26, 5 }
  0xb4   : > { %s3215_s13 = scalar_lea.vmem %s3513_s3, %s2269_s30  ;;  %p2227_p4 = scmp.ne.s32.totalorder %s2855_s24, 0 }
  0xb5   : > { %s3220_s16 = scalar_lea.vmem %s3564_s21, %s2269_s30  ;;  %v679_v0 = vld [vmem:[#allocation2] sm:$0xff] (!%p2227_p4)  ;;  %vm681_vm0 = vcmask (!%p2227_p4), 261120   ;;  %v680_v1 = vld [vmem:[#allocation2 + $0x8] sm:$0xff] (!%p2227_p4) }
  0xb6   : > { %s3225_s18 = scalar_lea.vmem %s3565_s7, %s2269_s30  ;;  %s3230_s23 = scalar_lea.vmem %s3566_s25, %s2272_s28  ;;  %682 = vst.msk [vmem:[#allocation11] sm:$0xff] (!%p2227_p4), %vm681_vm0, %v679_v0  ;;  %683 = vst.msk [vmem:[#allocation11 + $0x8] sm:$0xff] (!%p2227_p4), %vm681_vm0, %v680_v1 }
  0xb7   : > { %678 = sbr.rel (%p2227_p4) target bundleno = 190 (0xbe), region = 92 }
  0xb8   : > { %s672_s19 = scalar_lea.vmem %s3567_s27, %s3200_s26 }
  0xbe PF: > { %v3238_v2 = vld [vmem:[#allocation11] sm:$0xff]  ;;  %vm688_vm1 = vcmask 261120   ;;  %v3240_v3 = vld [vmem:[#allocation11 + $0x8] sm:$0xff]  ;;  %v2872_v17 = vmov 0.0   ;;  %v2574_v18 = vld [vmem:[%s3215_s13 + $0x8] sm:$0xff]   ;;  %vm2873_vm2 = vmmov 0   ;;  %s3568_s8 = scalar_lea.vmem %s3511_s1, %s3200_s26  ;;  %s3569_s28 = scalar_lea.vmem %s3512_s2, %s3200_s26 }
  0xbf   : > { %v689_v4 = vsel %vm688_vm1, %v3238_v2, 0.0  ;;  %v692_v5 = vsel %vm688_vm1, %v3240_v3, 0.0  ;;  %v2573_v16 = vld [vmem:[%s3215_s13] sm:$0xff]   ;;  %2319 = vmatprep.subr.bf16.mxu0 %v2872_v17  ;;  %2327 = vmatprep.subr.bf16.mxu1 %v2872_v17  ;;  %s2874_s13 = smov 96   ;;  %vm802_vm3 = vcmask 64512   ;;  %s2875_s14 = smov 64  }
  0xc0   : > { %690 = vadd.xlane.f32.xlu0 %v689_v4  ;;  %2320 = vmatpush3.bf16.msra.mxu0 %v2573_v16  ;;  %v2228_v27 = vld [vmem:[%s3568_s8] ss:$0 sm:$0xff]  ;;  %s2876_s17 = smov 88   ;;  %vm927_vm4 = vcmask 1043456   ;;  %s2877_s21 = smov 120   ;;  %vm1707_vm5 = vcmask 130048  }
  0xc1   : > { %2323 = vmatprep.mubr.msk.bf16.mxu0 %vm2873_vm2, %v2872_v17  ;;  %2321 = vmatprep.subr.bf16.mxu0 %v2872_v17  ;;  %v2229_v31 = vld [vmem:[%s3569_s28] ss:$0 sm:$0xff]  ;;  %s2878_s29 = smov 56   ;;  %s2879_s12 = smov 80   ;;  %vm1710_vm6 = vcmask 195584   ;;  %vm1947_vm7 = vcmask 523264  }
  0xc2   : > { %2329 = vmatprep.mubr.msk.bf16.mxu1 %vm2873_vm2, %v2872_v17  ;;  %s2880_s7 = smov 112   ;;  %s2881_s20 = smov 48  }
  0xc3   : > { %s2882_s25 = smov 72   ;;  %s2883_s27 = smov 104  }
  0xc4   : > { %693 = vadd.xlane.f32.xlu0 %v692_v5  ;;  %2322 = vmatpush3.bf16.msra.mxu0 %v2574_v18  ;;  %s2884_s24 = smov 40   ;;  %s2885_s4 = smov 8  }
  0xc5   : > { %2333 = vmatprep.subr.bf16.mxu0 %v2872_v17  ;;  %s2886_s8 = smov 16   ;;  %s2887_s11 = smov 24  }
  0xc6   : > { %s3571_s30 = scalar_lea.vmem [#allocation7], %s3185_s10  ;;  %s2888_s28 = smov [#allocation11]  }
  0xc7   : > { %p2487_p9 = scmp.eq.s32.totalorder %s3080_s5, 1 }
 0x14d   : > { %v691_v6 = vpop.xlane.xlu0 %690 }
 0x14e   : > { %v696_v7 = vmul.f32 0.03125, %v691_v6 }
 0x150   : > { %v698_v8 = vsub.f32 %v3238_v2, %v696_v7 }
 0x151   : > { %v694_v9 = vpop.xlane.xlu0 %693 }
 0x152   : > { %v697_v10 = vmul.f32 0.03125, %v694_v9  ;;  %v700_v11 = vmul.f32 %v698_v8, %v698_v8 }
 0x154   : > { %v699_v12 = vsub.f32 %v3240_v3, %v697_v10  ;;  %v702_v13 = vsel %vm688_vm1, %v700_v11, 0.0 }
 0x155   : > { %703 = vadd.xlane.f32.xlu1 %v702_v13 }
 0x156   : > { %v701_v14 = vmul.f32 %v699_v12, %v699_v12 }
 0x158   : > { %v705_v15 = vsel %vm688_vm1, %v701_v14, 0.0 }
 0x159   : > { %706 = vadd.xlane.f32.xlu1 %v705_v15 }
 0x1e2   : > { %v704_v19 = vpop.xlane.xlu1 %703 }
 0x1e3   : > { %v708_v20 = vmul.f32 0.03125, %v704_v19 }
 0x1e5   : > { %v710_v21 = vadd.f32 1e-05, %v708_v20 }
 0x1e6   : > { %v707_v22 = vpop.xlane.xlu1 %706 }
 0x1e7   : > { %2583 = vrsqrt.f32 %v710_v21  ;;  %v709_v23 = vmul.f32 0.03125, %v707_v22 }
 0x1e9   : > { %v711_v24 = vadd.f32 1e-05, %v709_v23 }
 0x1eb   : > { %2585 = vrsqrt.f32 %v711_v24 }
 0x1f1   : > { %v2584_v25 = vpop.eup %2583 }
 0x1f2   : > { %v714_v26 = vmul.f32 %v2584_v25, %v698_v8 }
 0x1f4   : > { %v722_v30 = vmul.f32 %v2228_v27, %v714_v26 }
 0x1f5   : > { %v2586_v28 = vpop.eup %2585 }
 0x1f6   : > { %v715_v29 = vmul.f32 %v2586_v28, %v699_v12  ;;  %v730_v33 = vadd.f32 %v2229_v31, %v722_v30 }
 0x1f8   : > { %v723_v32 = vmul.f32 %v2228_v27, %v715_v29 }
 0x1fa   : > { %v731_v34 = vadd.f32 %v2229_v31, %v723_v32 }
 0x1fc   : > { %v732_v35 = vpack.c.bf16 %v731_v34, %v730_v33 }
 0x1fe   : > { %2324 = vmatmul.mubr.msk.bf16.vlgmr.msra.gmra.mrb[0].mxu0 %vm688_vm1, %v732_v35 }
 0x1ff   : > { %2335 = vmatprep.mubr.msk.bf16.mxu0 %vm2873_vm2, %v2872_v17 }
 0x2d1   : > { %v786_v36 = vpop.f32.mrb[0].mxu0 }
 0x2d2   : > { %v3273_v37 = vpack.c.bf16 %v786_v36, %v786_v36  ;;  %v2325_v38 = vpop.f32.mrb[1].mxu0  ;;  %v793_v45 = vmul.f32 0.35355338, %v786_v36 }
 0x2d3   : > { %v789_v39 = vpop.f32.mrb[2].mxu0 }
 0x2d4   : > { %v3275_v40 = vpack.c.bf16 %v789_v39, %v789_v39  ;;  %800 = vrot.lane.b32.xlu0 %v3273_v37, %s2874_s13  ;;  %v2326_v41 = vpop.f32.mrb[3].mxu0  ;;  %v794_v47 = vmul.f32 0.35355338, %v789_v39  ;;  %v3283_v48 = vpack.c.bf16 %v793_v45, %v793_v45 }
 0x2d6   : > { %850 = vrot.lane.b32.xlu1 %v3275_v40, %s2874_s13  ;;  %v3285_v49 = vpack.c.bf16 %v794_v47, %v794_v47  ;;  %s2005_s13 = sshll.u32 %s2888_s28, 4  ;;  %s2006_s13 = int_to_ptr.vmem [resolvable:$true] %s2005_s13 }
 0x2d7   : > { %s2775_s26 = scalar_lea.vmem %s2006_s13, 256  ;;  %p2782_p2 = scmp.lt.s32.totalorder %s2006_s13, %s2006_s13 }
 0x2d8   : > { %p2776_p12 = scmp.ne.s32.totalorder %s2006_s13, %s2775_s26  ;;  %p2783_p6 = scmp.lt.s32.totalorder %s2775_s26, %s2775_s26 }
 0x2da   : > { %p2777_p13 = pnand %p2776_p12, %p2487_p9  ;;  %p2784_p0 = por %p2783_p6, %p2782_p2 }
 0x2dc   : > { %p2778_p8 = pneg %p2777_p13 }
 0x2de   : > { %p2785_p1 = pnand %p2784_p0, %p2778_p8 }
 0x346   : > { %v801_v42 = vpop.permute.xlu0 %800 }
 0x347   : > { %v807_v43 = vsel %vm802_vm3, %v801_v42, 0 }
 0x348   : > { %2328 = vmatpush3.bf16.xpose.msra.mxu1 %v807_v43  ;;  %v851_v44 = vpop.permute.xlu1 %850 }
 0x349   : > { %v856_v46 = vsel %vm802_vm3, %v851_v44, 0  ;;  %2339 = vmatprep.subr.bf16.mxu1 %v2872_v17 }
 0x34a   : > { %2334 = vmatpush3.bf16.xpose.msra.mxu0 %v856_v46 }
 0x34b   : > { %2345 = vmatprep.subr.bf16.mxu0 %v2872_v17 }
 0x34f   : > { %2330 = vmatmul.mubr.msk.bf16.vlgmr.msra.gmra.mrb[0].mxu1 %vm802_vm3, %v3283_v48 }
 0x350   : > { %2341 = vmatprep.mubr.msk.bf16.mxu1 %vm2873_vm2, %v2872_v17 }
 0x351   : > { %2336 = vmatmul.mubr.msk.bf16.vlgmr.msra.gmra.mrb[4].mxu0 %vm802_vm3, %v3285_v49 }
 0x352   : > { %2347 = vmatprep.mubr.msk.bf16.mxu0 %vm2873_vm2, %v2872_v17 }
 0x422   : > { %v843_v50 = vpop.f32.mrb[0].mxu1 }
 0x423   : > { %v2331_v51 = vpop.f32.mrb[1].mxu1  ;;  %v898_v52 = vsel %vm802_vm3, %v843_v50, -inf }
 0x424   : > { %v846_v53 = vpop.f32.mrb[2].mxu1  ;;  %899 = vmax.xlane.f32.xlu1 %v898_v52  ;;  %v892_v54 = vpop.f32.mrb[4].mxu0 }
 0x425   : > { %v2332_v55 = vpop.f32.mrb[3].mxu1  ;;  %v2337_v56 = vpop.f32.mrb[5].mxu0  ;;  %v901_v57 = vsel %vm802_vm3, %v892_v54, -inf }
 0x426   : > { %902 = vmax.xlane.f32.xlu0 %v901_v57  ;;  %v895_v58 = vpop.f32.mrb[6].mxu0 }
 0x427   : > { %v2338_v59 = vpop.f32.mrb[7].mxu0 }
 0x435   : > { %971 = vrot.lane.b32.xlu1 %v3275_v40, %s2875_s14 }
 0x439   : > { %1022 = vrot.lane.b32.xlu1 %v3273_v37, %s2876_s17 }
 0x4b1   : > { %v900_v60 = vpop.xlane.xlu1 %899 }
 0x4b2   : > { %v904_v61 = vsub.f32 %v843_v50, %v900_v60 }
 0x4b3   : > { %v903_v62 = vpop.xlane.xlu0 %902 }
 0x4b4   : > { %v906_v63 = vmul.f32 1.442695, %v904_v61  ;;  %v905_v0 = vsub.f32 %v892_v54, %v903_v62 }
 0x4b5   : > { %v972_v1 = vpop.permute.xlu1 %971 }
 0x4b6   : > { %2587 = vpow2.f32 %v906_v63  ;;  %v908_v4 = vmul.f32 1.442695, %v905_v0  ;;  %v977_v5 = vsel %vm927_vm4, %v972_v1, 0 }
 0x4b7   : > { %2346 = vmatpush3.bf16.msra.mxu0 %v977_v5 }
 0x4b8   : > { %2589 = vpow2.f32 %v908_v4  ;;  %2357 = vmatprep.subr.bf16.mxu0 %v2872_v17 }
 0x4b9   : > { %v1023_v10 = vpop.permute.xlu1 %1022 }
 0x4ba   : > { %v1028_v22 = vsel %vm802_vm3, %v1023_v10, 0 }
 0x4c0   : > { %v2588_v6 = vpop.eup %2587 }
 0x4c1   : > { %v910_v7 = vsel %vm802_vm3, %v2588_v6, 0.0 }
 0x4c2   : > { %v2590_v8 = vpop.eup %2589  ;;  %911 = vadd.xlane.f32.xlu0 %v910_v7 }
 0x4c3   : > { %v913_v9 = vsel %vm802_vm3, %v2590_v8, 0.0 }
 0x4c4   : > { %914 = vadd.xlane.f32.xlu1 %v913_v9 }
 0x4d5   : > { %1073 = vrot.lane.b32.xlu1 %v3275_v40, %s2876_s17 }
 0x4d8   : > { %922 = vrot.lane.b32.xlu0 %v3273_v37, %s2875_s14 }
 0x4d9   : > { %1071 = vrot.lane.b32.xlu1 %v3285_v49, %s2877_s21 }
 0x4dc   : > { %1020 = vrot.lane.b32.xlu0 %v3283_v48, %s2877_s21 }
 0x54f   : > { %v912_v11 = vpop.xlane.xlu0 %911 }
 0x550   : > { %2591 = vrcp.f32 %v912_v11 }
 0x551   : > { %v915_v12 = vpop.xlane.xlu1 %914 }
 0x552   : > { %2593 = vrcp.f32 %v915_v12 }
 0x553   : > { %v923_v13 = vpop.permute.xlu0 %922 }
 0x554   : > { %v929_v14 = vsel %vm927_vm4, %v923_v13, 0 }
 0x555   : > { %2340 = vmatpush3.bf16.msra.mxu1 %v929_v14  ;;  %v1074_v21 = vpop.permute.xlu1 %1073 }
 0x556   : > { %2351 = vmatprep.subr.bf16.mxu1 %v2872_v17  ;;  %v1079_v24 = vsel %vm802_vm3, %v1074_v21, 0 }
 0x557   : > { %v1021_v25 = vpop.permute.xlu0 %1020 }
 0x559   : > { %v1072_v26 = vpop.permute.xlu1 %1071 }
 0x55a   : > { %v2592_v15 = vpop.eup %2591 }
 0x55b   : > { %v918_v16 = vmul.f32 %v2592_v15, %v2588_v6 }
 0x55c   : > { %v2594_v18 = vpop.eup %2593 }
 0x55d   : > { %v919_v19 = vmul.f32 %v2594_v18, %v2590_v8  ;;  %v920_v20 = vpack.c.bf16 %v918_v16, %v918_v16 }
 0x55f   : > { %2342 = vmatmul.mubr.msk.bf16.vlgmr.msra.gmra.mrb[4].mxu1 %vm802_vm3, %v920_v20  ;;  %v921_v23 = vpack.c.bf16 %v919_v19, %v919_v19 }
 0x560   : > { %2352 = vmatpush3.bf16.xpose.msra.mxu1 %v1028_v22  ;;  %2353 = vmatprep.mubr.msk.bf16.mxu1 %vm2873_vm2, %v2872_v17 }
 0x561   : > { %2348 = vmatmul.mubr.msk.bf16.vlgmr.msra.gmra.mrb[8].mxu0 %vm802_vm3, %v921_v23  ;;  %2363 = vmatprep.subr.bf16.mxu1 %v2872_v17 }
 0x562   : > { %2358 = vmatpush3.bf16.xpose.msra.mxu0 %v1079_v24  ;;  %2359 = vmatprep.mubr.msk.bf16.mxu0 %vm2873_vm2, %v2872_v17 }
 0x563   : > { %2369 = vmatprep.subr.bf16.mxu0 %v2872_v17 }
 0x567   : > { %2354 = vmatmul.mubr.msk.bf16.vlgmr.msra.gmra.mrb[8].mxu1 %vm802_vm3, %v1021_v25 }
 0x568   : > { %2365 = vmatprep.mubr.msk.bf16.mxu1 %vm2873_vm2, %v2872_v17 }
 0x569   : > { %2360 = vmatmul.mubr.msk.bf16.vlgmr.msra.gmra.mrb[12].mxu0 %vm802_vm3, %v1072_v26 }
 0x56a   : > { %2371 = vmatprep.mubr.msk.bf16.mxu0 %vm2873_vm2, %v2872_v17 }
 0x632   : > { %v3325_v27 = vpop.f32.mrb[4].mxu1 }
 0x633   : > { %v2343_v28 = vpop.f32.mrb[5].mxu1 }
 0x634   : > { %v968_v29 = vpop.f32.mrb[6].mxu1  ;;  %v3327_v30 = vpop.f32.mrb[8].mxu0 }
 0x635   : > { %v2344_v31 = vpop.f32.mrb[7].mxu1  ;;  %v2349_v32 = vpop.f32.mrb[9].mxu0 }
 0x636   : > { %v1016_v33 = vpop.f32.mrb[10].mxu0 }
 0x637   : > { %v2350_v34 = vpop.f32.mrb[11].mxu0 }
 0x63a   : > { %v1064_v35 = vpop.f32.mrb[8].mxu1 }
 0x63b   : > { %v2355_v36 = vpop.f32.mrb[9].mxu1  ;;  %v1121_v38 = vsel %vm802_vm3, %v1064_v35, -inf }
 0x63c   : > { %1122 = vmax.xlane.f32.xlu0 %v1121_v38  ;;  %v1067_v39 = vpop.f32.mrb[10].mxu1  ;;  %v1115_v41 = vpop.f32.mrb[12].mxu0 }
 0x63d   : > { %v2356_v42 = vpop.f32.mrb[11].mxu1  ;;  %v2361_v43 = vpop.f32.mrb[13].mxu0  ;;  %v1124_v44 = vsel %vm802_vm3, %v1115_v41, -inf }
 0x63e   : > { %1125 = vmax.xlane.f32.xlu1 %v1124_v44  ;;  %v1118_v45 = vpop.f32.mrb[14].mxu0 }
 0x63f   : > { %v2362_v46 = vpop.f32.mrb[15].mxu0 }
 0x64f   : > { %1193 = vrot.lane.b32.xlu1 %v3275_v40, %s2878_s29 }
 0x653   : > { %1243 = vrot.lane.b32.xlu1 %v3273_v37, %s2879_s12 }
 0x657   : > { %1293 = vrot.lane.b32.xlu1 %v3275_v40, %s2879_s12 }
 0x65b   : > { %1291 = vrot.lane.b32.xlu1 %v3285_v49, %s2880_s7 }
 0x6c9   : > { %v1123_v47 = vpop.xlane.xlu0 %1122 }
 0x6ca   : > { %v1127_v50 = vsub.f32 %v1064_v35, %v1123_v47 }
 0x6cb   : > { %v1126_v51 = vpop.xlane.xlu1 %1125 }
 0x6cc   : > { %v1129_v52 = vmul.f32 1.442695, %v1127_v50  ;;  %v1128_v53 = vsub.f32 %v1115_v41, %v1126_v51 }
 0x6ce   : > { %2595 = vpow2.f32 %v1129_v52  ;;  %v1131_v54 = vmul.f32 1.442695, %v1128_v53 }
 0x6cf   : > { %v1194_v55 = vpop.permute.xlu1 %1193 }
 0x6d0   : > { %2597 = vpow2.f32 %v1131_v54  ;;  %v1199_v56 = vsel %vm927_vm4, %v1194_v55, 0 }
 0x6d1   : > { %2370 = vmatpush3.bf16.msra.mxu0 %v1199_v56 }
 0x6d2   : > { %2381 = vmatprep.subr.bf16.mxu0 %v2872_v17 }
 0x6d3   : > { %v1244_v4 = vpop.permute.xlu1 %1243 }
 0x6d4   : > { %v1249_v10 = vsel %vm802_vm3, %v1244_v4, 0 }
 0x6d7   : > { %v1294_v9 = vpop.permute.xlu1 %1293 }
 0x6d8   : > { %v2596_v57 = vpop.eup %2595  ;;  %v1299_v12 = vsel %vm802_vm3, %v1294_v9, 0 }
 0x6d9   : > { %v1133_v58 = vsel %vm802_vm3, %v2596_v57, 0.0 }
 0x6da   : > { %v2598_v59 = vpop.eup %2597  ;;  %1134 = vadd.xlane.f32.xlu0 %v1133_v58 }
 0x6db   : > { %v1136_v60 = vsel %vm802_vm3, %v2598_v59, 0.0  ;;  %v1292_v14 = vpop.permute.xlu1 %1291 }
 0x6de   : > { %1137 = vadd.xlane.f32.xlu0 %v1136_v60 }
 0x6f4   : > { %1145 = vrot.lane.b32.xlu0 %v3273_v37, %s2878_s29 }
 0x6f8   : > { %1241 = vrot.lane.b32.xlu0 %v3283_v48, %s2880_s7 }
 0x767   : > { %v1135_v61 = vpop.xlane.xlu0 %1134 }
 0x768   : > { %2599 = vrcp.f32 %v1135_v61 }
 0x76b   : > { %v1138_v62 = vpop.xlane.xlu0 %1137 }
 0x76c   : > { %2601 = vrcp.f32 %v1138_v62 }
 0x76f   : > { %v1146_v63 = vpop.permute.xlu0 %1145 }
 0x770   : > { %v1151_v0 = vsel %vm927_vm4, %v1146_v63, 0 }
 0x771   : > { %2364 = vmatpush3.bf16.msra.mxu1 %v1151_v0 }
 0x772   : > { %v2600_v1 = vpop.eup %2599  ;;  %2375 = vmatprep.subr.bf16.mxu1 %v2872_v17 }
 0x773   : > { %v1141_v5 = vmul.f32 %v2600_v1, %v2596_v57  ;;  %v1242_v13 = vpop.permute.xlu0 %1241 }
 0x775   : > { %v1143_v6 = vpack.c.bf16 %v1141_v5, %v1141_v5 }
 0x776   : > { %v2602_v7 = vpop.eup %2601 }
 0x777   : > { %v1142_v8 = vmul.f32 %v2602_v7, %v2598_v59  ;;  %2366 = vmatmul.mubr.msk.bf16.vlgmr.msra.gmra.mrb[12].mxu1 %vm802_vm3, %v1143_v6 }
 0x778   : > { %2377 = vmatprep.mubr.msk.bf16.mxu1 %vm2873_vm2, %v2872_v17 }
 0x779   : > { %v1144_v11 = vpack.c.bf16 %v1142_v8, %v1142_v8 }
 0x77a   : > { %2376 = vmatpush3.bf16.xpose.msra.mxu1 %v1249_v10 }
 0x77b   : > { %2372 = vmatmul.mubr.msk.bf16.vlgmr.msra.gmra.mrb[16].mxu0 %vm802_vm3, %v1144_v11  ;;  %2387 = vmatprep.subr.bf16.mxu1 %v2872_v17 }
 0x77c   : > { %2382 = vmatpush3.bf16.xpose.msra.mxu0 %v1299_v12  ;;  %2383 = vmatprep.mubr.msk.bf16.mxu0 %vm2873_vm2, %v2872_v17 }
 0x77d   : > { %2393 = vmatprep.subr.bf16.mxu0 %v2872_v17 }
 0x781   : > { %2378 = vmatmul.mubr.msk.bf16.vlgmr.msra.gmra.mrb[16].mxu1 %vm802_vm3, %v1242_v13 }
 0x782   : > { %2389 = vmatprep.mubr.msk.bf16.mxu1 %vm2873_vm2, %v2872_v17 }
 0x783   : > { %2384 = vmatmul.mubr.msk.bf16.vlgmr.msra.gmra.mrb[20].mxu0 %vm802_vm3, %v1292_v14 }
 0x784   : > { %2395 = vmatprep.mubr.msk.bf16.mxu0 %vm2873_vm2, %v2872_v17 }
 0x84a   : > { %v3359_v15 = vpop.f32.mrb[12].mxu1 }
 0x84b   : > { %v2367_v16 = vpop.f32.mrb[13].mxu1 }
 0x84c   : > { %v1190_v18 = vpop.f32.mrb[14].mxu1 }
 0x84d   : > { %v2368_v19 = vpop.f32.mrb[15].mxu1 }
 0x84e   : > { %v3361_v20 = vpop.f32.mrb[16].mxu0 }
 0x84f   : > { %v2558_v21 = vpack.i.bf16 %v3361_v20, %v3359_v15  ;;  %v2373_v22 = vpop.f32.mrb[17].mxu0 }
 0x850   : > { %v1238_v23 = vpop.f32.mrb[18].mxu0 }
 0x851   : > { %v2374_v24 = vpop.f32.mrb[19].mxu0 }
 0x854   : > { %v1285_v25 = vpop.f32.mrb[16].mxu1 }
 0x855   : > { %v2379_v26 = vpop.f32.mrb[17].mxu1  ;;  %v1341_v28 = vsel %vm802_vm3, %v1285_v25, -inf }
 0x856   : > { %1342 = vmax.xlane.f32.xlu0 %v1341_v28  ;;  %v1288_v29 = vpop.f32.mrb[18].mxu1  ;;  %v1335_v31 = vpop.f32.mrb[20].mxu0 }
 0x857   : > { %v2380_v32 = vpop.f32.mrb[19].mxu1  ;;  %v2385_v33 = vpop.f32.mrb[21].mxu0  ;;  %v1344_v34 = vsel %vm802_vm3, %v1335_v31, -inf }
 0x858   : > { %1345 = vmax.xlane.f32.xlu1 %v1344_v34  ;;  %v1338_v35 = vpop.f32.mrb[22].mxu0 }
 0x859   : > { %v2386_v36 = vpop.f32.mrb[23].mxu0 }
 0x869   : > { %1413 = vrot.lane.b32.xlu1 %v3275_v40, %s2881_s20 }
 0x86d   : > { %1463 = vrot.lane.b32.xlu1 %v3273_v37, %s2882_s25 }
 0x871   : > { %1513 = vrot.lane.b32.xlu1 %v3275_v40, %s2882_s25 }
 0x875   : > { %1511 = vrot.lane.b32.xlu1 %v3285_v49, %s2883_s27 }
 0x8e3   : > { %v1343_v38 = vpop.xlane.xlu0 %1342 }
 0x8e4   : > { %v1347_v39 = vsub.f32 %v1285_v25, %v1343_v38 }
 0x8e5   : > { %v1346_v41 = vpop.xlane.xlu1 %1345 }
 0x8e6   : > { %v1349_v42 = vmul.f32 1.442695, %v1347_v39  ;;  %v1348_v43 = vsub.f32 %v1335_v31, %v1346_v41 }
 0x8e8   : > { %2603 = vpow2.f32 %v1349_v42  ;;  %v1351_v44 = vmul.f32 1.442695, %v1348_v43 }
 0x8e9   : > { %v1414_v45 = vpop.permute.xlu1 %1413 }
 0x8ea   : > { %2605 = vpow2.f32 %v1351_v44  ;;  %v1419_v46 = vsel %vm927_vm4, %v1414_v45, 0 }
 0x8eb   : > { %2394 = vmatpush3.bf16.msra.mxu0 %v1419_v46 }
 0x8ec   : > { %2405 = vmatprep.subr.bf16.mxu0 %v2872_v17 }
 0x8ed   : > { %v1464_v57 = vpop.permute.xlu1 %1463 }
 0x8f1   : > { %v1514_v62 = vpop.permute.xlu1 %1513 }
 0x8f2   : > { %v2604_v47 = vpop.eup %2603  ;;  %v1519_v0 = vsel %vm802_vm3, %v1514_v62, 0 }
 0x8f3   : > { %v1353_v50 = vsel %vm802_vm3, %v2604_v47, 0.0 }
 0x8f4   : > { %v2606_v51 = vpop.eup %2605  ;;  %1354 = vadd.xlane.f32.xlu0 %v1353_v50 }
 0x8f5   : > { %v1356_v49 = vsel %vm802_vm3, %v2606_v51, 0.0  ;;  %v1512_v4 = vpop.permute.xlu1 %1511 }
 0x8f8   : > { %1357 = vadd.xlane.f32.xlu0 %v1356_v49  ;;  %v2576_v49 = vld [vmem:[%s3220_s16 + $0x8] sm:$0xff]  }
 0x90e   : > { %1365 = vrot.lane.b32.xlu0 %v3273_v37, %s2881_s20 }
 0x912   : > { %1461 = vrot.lane.b32.xlu0 %v3283_v48, %s2883_s27  ;;  %v1469_v48 = vsel %vm802_vm3, %v1464_v57, 0 }
 0x981   : > { %v1355_v52 = vpop.xlane.xlu0 %1354 }
 0x982   : > { %2607 = vrcp.f32 %v1355_v52 }
 0x985   : > { %v1358_v53 = vpop.xlane.xlu0 %1357 }
 0x986   : > { %2609 = vrcp.f32 %v1358_v53 }
 0x989   : > { %v1366_v54 = vpop.permute.xlu0 %1365 }
 0x98a   : > { %v1371_v55 = vsel %vm927_vm4, %v1366_v54, 0 }
 0x98b   : > { %2388 = vmatpush3.bf16.msra.mxu1 %v1371_v55 }
 0x98c   : > { %v2608_v56 = vpop.eup %2607  ;;  %2399 = vmatprep.subr.bf16.mxu1 %v2872_v17 }
 0x98d   : > { %v1361_v58 = vmul.f32 %v2608_v56, %v2604_v47  ;;  %v1462_v1 = vpop.permute.xlu0 %1461 }
 0x98f   : > { %v1363_v59 = vpack.c.bf16 %v1361_v58, %v1361_v58 }
 0x990   : > { %v2610_v60 = vpop.eup %2609 }
 0x991   : > { %v1362_v61 = vmul.f32 %v2610_v60, %v2606_v51  ;;  %2390 = vmatmul.mubr.msk.bf16.vlgmr.msra.gmra.mrb[20].mxu1 %vm802_vm3, %v1363_v59  ;;  %v2575_v51 = vld [vmem:[%s3220_s16] sm:$0xff]   ;;  %s3570_s16 = scalar_lea.vmem [#allocation5], %s3185_s10 }
 0x992   : > { %2401 = vmatprep.mubr.msk.bf16.mxu1 %vm2873_vm2, %v2872_v17 }
 0x993   : > { %v1364_v63 = vpack.c.bf16 %v1362_v61, %v1362_v61 }
 0x994   : > { %2400 = vmatpush3.bf16.xpose.msra.mxu1 %v1469_v48 }
 0x995   : > { %2396 = vmatmul.mubr.msk.bf16.vlgmr.msra.gmra.mrb[24].mxu0 %vm802_vm3, %v1364_v63  ;;  %2411 = vmatprep.subr.bf16.mxu1 %v2872_v17 }
 0x996   : > { %2406 = vmatpush3.bf16.xpose.msra.mxu0 %v1519_v0  ;;  %2407 = vmatprep.mubr.msk.bf16.mxu0 %vm2873_vm2, %v2872_v17 }
 0x997   : > { %2417 = vmatprep.subr.bf16.mxu0 %v2872_v17 }
 0x99b   : > { %2402 = vmatmul.mubr.msk.bf16.vlgmr.msra.gmra.mrb[24].mxu1 %vm802_vm3, %v1462_v1 }
 0x99c   : > { %2413 = vmatprep.mubr.msk.bf16.mxu1 %vm2873_vm2, %v2872_v17 }
 0x99d   : > { %2408 = vmatmul.mubr.msk.bf16.vlgmr.msra.gmra.mrb[28].mxu0 %vm802_vm3, %v1512_v4 }
 0x99e   : > { %2419 = vmatprep.mubr.msk.bf16.mxu0 %vm2873_vm2, %v2872_v17 }
 0xa64   : > { %v1407_v5 = vpop.f32.mrb[20].mxu1 }
 0xa65   : > { %v2391_v6 = vpop.f32.mrb[21].mxu1 }
 0xa66   : > { %v1410_v7 = vpop.f32.mrb[22].mxu1 }
 0xa67   : > { %v2392_v8 = vpop.f32.mrb[23].mxu1 }
 0xa68   : > { %v1455_v9 = vpop.f32.mrb[24].mxu0 }
 0xa69   : > { %v2563_v10 = vpack.i.bf16 %v1455_v9, %v1407_v5  ;;  %v2397_v11 = vpop.f32.mrb[25].mxu0 }
 0xa6a   : > { %v1458_v12 = vpop.f32.mrb[26].mxu0 }
 0xa6b   : > { %v2398_v13 = vpop.f32.mrb[27].mxu0 }
 0xa6e   : > { %v1505_v14 = vpop.f32.mrb[24].mxu1 }
 0xa6f   : > { %v2403_v16 = vpop.f32.mrb[25].mxu1  ;;  %v1561_v18 = vsel %vm802_vm3, %v1505_v14, -inf }
 0xa70   : > { %1562 = vmax.xlane.f32.xlu0 %v1561_v18  ;;  %v1508_v19 = vpop.f32.mrb[26].mxu1  ;;  %v1555_v22 = vpop.f32.mrb[28].mxu0  ;;  %v2252_v16 = vld [vmem:[%s3570_s16] ss:$0 sm:$0xff] }
 0xa71   : > { %v2404_v23 = vpop.f32.mrb[27].mxu1  ;;  %v2409_v24 = vpop.f32.mrb[29].mxu0  ;;  %v1564_v25 = vsel %vm802_vm3, %v1555_v22, -inf }
 0xa72   : > { %1565 = vmax.xlane.f32.xlu1 %v1564_v25  ;;  %v1558_v26 = vpop.f32.mrb[30].mxu0 }
 0xa73   : > { %v2410_v28 = vpop.f32.mrb[31].mxu0 }
 0xa83   : > { %1633 = vrot.lane.b32.xlu1 %v3275_v40, %s2884_s24 }
 0xa87   : > { %2559 = vrot.lane.b32.xlu1 %v2558_v21, %s2885_s4 }
 0xa8b   : > { %2564 = vrot.lane.b32.xlu1 %v2563_v10, %s2886_s8 }
 0xafd   : > { %v1563_v29 = vpop.xlane.xlu0 %1562 }
 0xafe   : > { %v1567_v31 = vsub.f32 %v1505_v14, %v1563_v29 }
 0xaff   : > { %v1566_v32 = vpop.xlane.xlu1 %1565 }
 0xb00   : > { %v1569_v33 = vmul.f32 1.442695, %v1567_v31  ;;  %v1568_v34 = vsub.f32 %v1555_v22, %v1566_v32 }
 0xb02   : > { %2611 = vpow2.f32 %v1569_v33  ;;  %v1571_v35 = vmul.f32 1.442695, %v1568_v34 }
 0xb03   : > { %v1634_v36 = vpop.permute.xlu1 %1633 }
 0xb04   : > { %2613 = vpow2.f32 %v1571_v35  ;;  %v1639_v38 = vsel %vm927_vm4, %v1634_v36, 0 }
 0xb05   : > { %2418 = vmatpush3.bf16.msra.mxu0 %v1639_v38  ;;  %v2577_v38 = vld [vmem:[%s3225_s18] sm:$0xff]  }
 0xb06   : > { %2431 = vmatprep.subr.bf16.mxu0 %v2872_v17 }
 0xb07   : > { %v2560_v61 = vpop.permute.xlu1 %2559 }
 0xb08   : > { %v2562_v48 = vunpack.i.h.bf16 %v2560_v61  ;;  %v2561_v63 = vunpack.i.l.bf16 %v2560_v61 }
 0xb0a   : > { %v1706_v5 = vsel %vm802_vm3, %v3327_v30, %v2562_v48  ;;  %v1705_v6 = vsel %vm802_vm3, %v3325_v27, %v2561_v63 }
 0xb0b   : > { %v2565_v62 = vpop.permute.xlu1 %2564 }
 0xb0c   : > { %v2612_v40 = vpop.eup %2611  ;;  %v2567_v0 = vunpack.i.h.bf16 %v2565_v62  ;;  %v2566_v1 = vunpack.i.l.bf16 %v2565_v62 }
 0xb0d   : > { %v1573_v15 = vsel %vm802_vm3, %v2612_v40, 0.0 }
 0xb0e   : > { %v2614_v20 = vpop.eup %2613  ;;  %1574 = vadd.xlane.f32.xlu0 %v1573_v15  ;;  %v1708_v9 = vsel %vm1707_vm5, %v1705_v6, %v2566_v1  ;;  %v1709_v10 = vsel %vm1707_vm5, %v1706_v5, %v2567_v0 }
 0xb0f   : > { %v1576_v21 = vsel %vm802_vm3, %v2614_v20, 0.0 }
 0xb12   : > { %1577 = vadd.xlane.f32.xlu0 %v1576_v21 }
 0xb28   : > { %1585 = vrot.lane.b32.xlu0 %v3273_v37, %s2884_s24 }
 0xb9b   : > { %v1575_v39 = vpop.xlane.xlu0 %1574 }
 0xb9c   : > { %2615 = vrcp.f32 %v1575_v39 }
 0xb9f   : > { %v1578_v41 = vpop.xlane.xlu0 %1577 }
 0xba0   : > { %2617 = vrcp.f32 %v1578_v41 }
 0xba3   : > { %v1586_v42 = vpop.permute.xlu0 %1585 }
 0xba4   : > { %v1591_v43 = vsel %vm927_vm4, %v1586_v42, 0 }
 0xba5   : > { %2412 = vmatpush3.bf16.msra.mxu1 %v1591_v43 }
 0xba6   : > { %v2616_v44 = vpop.eup %2615  ;;  %2423 = vmatprep.subr.bf16.mxu1 %v2872_v17 }
 0xba7   : > { %v1581_v45 = vmul.f32 %v2616_v44, %v2612_v40  ;;  %v2578_v40 = vld [vmem:[%s3225_s18 + $0x8] sm:$0xff]   ;;  %s3572_s18 = scalar_lea.vmem [#allocation8], %s3185_s10 }
 0xba9   : > { %v1583_v46 = vpack.c.bf16 %v1581_v45, %v1581_v45  ;;  %v2253_v45 = vld [vmem:[%s3571_s30] ss:$0 sm:$0xff] }
 0xbaa   : > { %v2618_v47 = vpop.eup %2617 }
 0xbab   : > { %v1582_v50 = vmul.f32 %v2618_v47, %v2614_v20  ;;  %2414 = vmatmul.mubr.msk.bf16.vlgmr.msra.gmra.mrb[28].mxu1 %vm802_vm3, %v1583_v46 }
 0xbac   : > { %2427 = vmatprep.mubr.msk.bf16.mxu1 %vm2873_vm2, %v2872_v17  ;;  %2424 = vmatpush3.bf16.msra.mxu1 %v2575_v51 }
 0xbad   : > { %v1584_v37 = vpack.c.bf16 %v1582_v50, %v1582_v50  ;;  %2425 = vmatprep.subr.bf16.mxu1 %v2872_v17 }
 0xbaf   : > { %2420 = vmatmul.mubr.msk.bf16.vlgmr.msra.gmra.mrb[32].mxu0 %vm802_vm3, %v1584_v37  ;;  %v2254_v37 = vld [vmem:[%s3572_s18] ss:$0 sm:$0xff] }
 0xbb0   : > { %2435 = vmatprep.mubr.msk.bf16.mxu0 %vm2873_vm2, %v2872_v17  ;;  %2426 = vmatpush3.bf16.msra.mxu1 %v2576_v49 }
 0xbb1   : > { %2439 = vmatprep.subr.bf16.mxu1 %v2872_v17  ;;  %2432 = vmatpush3.bf16.msra.mxu0 %v2577_v38 }
 0xbb2   : > { %2433 = vmatprep.subr.bf16.mxu0 %v2872_v17 }
 0xbb5   : > { %2434 = vmatpush3.bf16.msra.mxu0 %v2578_v40 }
 0xc7e   : > { %v1627_v52 = vpop.f32.mrb[28].mxu1 }
 0xc7f   : > { %v2415_v53 = vpop.f32.mrb[29].mxu1 }
 0xc80   : > { %v1630_v54 = vpop.f32.mrb[30].mxu1 }
 0xc81   : > { %v2416_v55 = vpop.f32.mrb[31].mxu1  ;;  %v2579_v54 = vld [vmem:[%s3230_s23] sm:$0xff]  }
 0xc82   : > { %v1675_v56 = vpop.f32.mrb[32].mxu0  ;;  %v2580_v55 = vld [vmem:[%s3230_s23 + $0x8] sm:$0xff]  }
 0xc83   : > { %v2568_v57 = vpack.i.bf16 %v1675_v56, %v1627_v52  ;;  %v2421_v58 = vpop.f32.mrb[33].mxu0  ;;  %v2581_v56 = vld [vmem:[%s3230_s23 + $0x10] sm:$0xff]  }
 0xc84   : > { %v1678_v59 = vpop.f32.mrb[34].mxu0  ;;  %v2255_v58 = vld [vmem:[%s567_s15] ss:$0 sm:$0xff] }
 0xc85   : > { %2569 = vrot.lane.b32.xlu0 %v2568_v57, %s2887_s11  ;;  %v2422_v60 = vpop.f32.mrb[35].mxu0  ;;  %v2582_v57 = vld [vmem:[%s3230_s23 + $0x18] sm:$0xff]  }
 0xcf7   : > { %v2570_v4 = vpop.permute.xlu0 %2569 }
 0xcf8   : > { %v2572_v7 = vunpack.i.h.bf16 %v2570_v4  ;;  %v2571_v8 = vunpack.i.l.bf16 %v2570_v4 }
 0xcfa   : > { %v1712_v11 = vsel %vm1710_vm6, %v1709_v10, %v2572_v7  ;;  %v1711_v12 = vsel %vm1710_vm6, %v1708_v9, %v2571_v8 }
 0xcfb   : > { %v1713_v13 = vpack.c.bf16 %v1712_v11, %v1711_v12  ;;  %v2259_v12 = vld [vmem:[%s672_s19] ss:$0 sm:$0xff] }
 0xcfd   : > { %2428 = vmatmul.mubr.msk.bf16.vlgmr.msra.gmra.mrb[32].mxu1 %vm688_vm1, %v1713_v13 }
 0xcfe   : > { %2447 = vmatprep.mubr.msk.bf16.mxu1 %vm2873_vm2, %v2872_v17  ;;  %2440 = vmatpush3.bf16.msra.mxu1 %v2579_v54 }
 0xcff   : > { %2441 = vmatprep.subr.bf16.mxu1 %v2872_v17 }
 0xd02   : > { %2442 = vmatpush3.bf16.msra.mxu1 %v2580_v55 }
 0xd03   : > { %2443 = vmatprep.subr.bf16.mxu1 %v2872_v17 }
 0xd06   : > { %2444 = vmatpush3.bf16.msra.mxu1 %v2581_v56 }
 0xd07   : > { %2445 = vmatprep.subr.bf16.mxu1 %v2872_v17 }
 0xd0a   : > { %2446 = vmatpush3.bf16.msra.mxu1 %v2582_v57 }
 0xdd0   : > { %v1767_v14 = vpop.f32.mrb[32].mxu1 }
 0xdd1   : > { %v1774_v30 = vadd.f32 %v1767_v14, %v3238_v2  ;;  %v2429_v18 = vpop.f32.mrb[33].mxu1 }
 0xdd2   : > { %v1770_v19 = vpop.f32.mrb[34].mxu1 }
 0xdd3   : > { %v3429_v27 = vadd.f32 %v2252_v16, %v1774_v30  ;;  %v1775_v22 = vadd.f32 %v1770_v19, %v3240_v3  ;;  %v2430_v23 = vpop.f32.mrb[35].mxu1 }
 0xdd5   : > { %v3432_v24 = vadd.f32 %v2252_v16, %v1775_v22  ;;  %v1787_v25 = vsel %vm688_vm1, %v3429_v27, 0.0 }
 0xdd6   : > { %1788 = vadd.xlane.f32.xlu1 %v1787_v25 }
 0xdd7   : > { %v1790_v26 = vsel %vm688_vm1, %v3432_v24, 0.0 }
 0xdd8   : > { %1791 = vadd.xlane.f32.xlu0 %v1790_v26 }
 0xe63   : > { %v1789_v2 = vpop.xlane.xlu1 %1788 }
 0xe64   : > { %v1793_v28 = vmul.f32 0.03125, %v1789_v2 }
 0xe65   : > { %v1792_v29 = vpop.xlane.xlu0 %1791 }
 0xe66   : > { %v1795_v31 = vsub.f32 %v3429_v27, %v1793_v28  ;;  %v1794_v32 = vmul.f32 0.03125, %v1792_v29 }
 0xe68   : > { %v1796_v3 = vsub.f32 %v3432_v24, %v1794_v32  ;;  %v1797_v33 = vmul.f32 %v1795_v31, %v1795_v31 }
 0xe6a   : > { %v1799_v34 = vsel %vm688_vm1, %v1797_v33, 0.0  ;;  %v1798_v35 = vmul.f32 %v1796_v3, %v1796_v3 }
 0xe6b   : > { %1800 = vadd.xlane.f32.xlu0 %v1799_v34 }
 0xe6c   : > { %v1802_v36 = vsel %vm688_vm1, %v1798_v35, 0.0 }
 0xe6f   : > { %1803 = vadd.xlane.f32.xlu0 %v1802_v36 }
 0xef8   : > { %v1801_v15 = vpop.xlane.xlu0 %1800 }
 0xef9   : > { %v1805_v20 = vmul.f32 0.03125, %v1801_v15 }
 0xefb   : > { %v1807_v21 = vadd.f32 1e-05, %v1805_v20 }
 0xefc   : > { %v1804_v39 = vpop.xlane.xlu0 %1803 }
 0xefd   : > { %2619 = vrsqrt.f32 %v1807_v21  ;;  %v1806_v41 = vmul.f32 0.03125, %v1804_v39 }
 0xeff   : > { %v1808_v42 = vadd.f32 1e-05, %v1806_v41 }
 0xf01   : > { %2621 = vrsqrt.f32 %v1808_v42 }
 0xf07   : > { %v2620_v43 = vpop.eup %2619 }
 0xf08   : > { %v1811_v44 = vmul.f32 %v2620_v43, %v1795_v31 }
 0xf0a   : > { %v1819_v47 = vmul.f32 %v2253_v45, %v1811_v44 }
 0xf0b   : > { %v2622_v46 = vpop.eup %2621 }
 0xf0c   : > { %v1812_v50 = vmul.f32 %v2622_v46, %v1796_v3  ;;  %v1827_v49 = vadd.f32 %v2254_v37, %v1819_v47 }
 0xf0e   : > { %v1820_v51 = vmul.f32 %v2253_v45, %v1812_v50 }
 0xf10   : > { %v1828_v52 = vadd.f32 %v2254_v37, %v1820_v51 }
 0xf12   : > { %v1829_v53 = vpack.c.bf16 %v1828_v52, %v1827_v49 }
 0xf14   : > { %2436 = vmatmul.mubr.msk.bf16.vlgmr.msra.gmra.mrb[36].mxu0 %vm688_vm1, %v1829_v53 }
 0xfe7   : > { %v1890_v59 = vpop.f32.mrb[36].mxu0 }
 0xfe8   : > { %v1891_v60 = vadd.f32 %v2255_v58, %v1890_v59  ;;  %v2437_v61 = vpop.f32.mrb[37].mxu0 }
 0xfe9   : > { %v1893_v62 = vpop.f32.mrb[38].mxu0 }
 0xfea   : > { %v1899_v48 = vmul.f32 0.70710677, %v1891_v60  ;;  %v1894_v63 = vadd.f32 %v2255_v58, %v1893_v62  ;;  %v2438_v0 = vpop.f32.mrb[39].mxu0  ;;  %v1897_v7 = vmul.f32 0.5, %v1891_v60 }
 0xfec   : > { %2623 = verf.f32 %v1899_v48  ;;  %v1900_v1 = vmul.f32 0.70710677, %v1894_v63  ;;  %v1898_v17 = vmul.f32 0.5, %v1894_v63 }
 0xfee   : > { %2625 = verf.f32 %v1900_v1 }
 0xff6   : > { %v2624_v4 = vpop.eup %2623 }
 0xff7   : > { %v1903_v5 = vadd.f32 1.0, %v2624_v4 }
 0xff8   : > { %v2626_v6 = vpop.eup %2625 }
 0xff9   : > { %v1904_v8 = vadd.f32 1.0, %v2626_v6  ;;  %v1905_v9 = vmul.f32 %v1903_v5, %v1897_v7 }
 0xffb   : > { %v1906_v10 = vmul.f32 %v1904_v8, %v1898_v17 }
 0xffd   : > { %v1907_v11 = vpack.c.bf16 %v1906_v10, %v1905_v9 }
 0xfff   : > { %2448 = vmatmul.mubr.msk.bf16.vlgmr.msra.gmra.mrb[36].mxu1 %vm1947_vm7, %v1907_v11 }
0x10d2   : > { %v1985_v13 = vpop.f32.mrb[36].mxu1 }
0x10d3   : > { %v1986_v14 = vadd.f32 %v2259_v12, %v1985_v13  ;;  %v2449_v16 = vpop.f32.mrb[37].mxu1 }
0x10d4   : > { %v1988_v30 = vpop.f32.mrb[38].mxu1 }
0x10d5   : > { %v1992_v18 = vadd.f32 %v1986_v14, %v3429_v27  ;;  %v1989_v19 = vadd.f32 %v2259_v12, %v1988_v30  ;;  %v2450_v22 = vpop.f32.mrb[39].mxu1 }
0x10d7   : > { %1994 = vst.msk [vmem:[#allocation11] sm:$0xff] %vm688_vm1, %v1992_v18  ;;  %v1993_v23 = vadd.f32 %v1989_v19, %v3432_v24 }
0x10d9   : > { %1995 = vst.msk [vmem:[#allocation11 + $0x8] sm:$0xff] %vm688_vm1, %v1993_v23 }
0x10da   : > { %2788 = shalt.err (!%p2785_p1)
}
0x10db   : > { %s3574_s17 = sld [smem:[#allocation27_spill]] }
0x10e1   : > { %s2789_s21 = scalar_lea.hbm %s3574_s17, 256 }
0x10e2   : > { %p2790_p7 = scmp.ne.s32.totalorder %s3574_s17, %s2789_s21  ;;  %p2795_p5 = scmp.lt.u32.totalorder %s2789_s21, %s3574_s17 }
0x10e4   : > { %p2791_p10 = pnand %p2790_p7, %p2487_p9 }
0x10e6   : > { %p2792_p11 = pneg %p2791_p10 }
0x10e8   : > { %p2797_p3 = pnand %p2795_p5, %p2792_p11 }
0x10ea   : > { %2800 = shalt.err (!%p2797_p3)
}
0x10eb   : > { %s2889_s25 = smov 128  }
0x10ec   : > { %2464 = dma.vmem_to_hbm [thread:$0]  (%p2487_p9), %s2006_s13, 256, %s3574_s17, [#allocation4], %s2889_s25, %s2889_s25, %s2885_s4  }
0x10ed   : > { %2838 = dma.done.wait (%p2487_p9), [#allocation4], 256  }
0x10ee   : > { %2840 = vsyncadd (%p2487_p9), [#allocation4], 4294967040 }
0x10ef PF: > { %s3575_s8 = sld [smem:[#allocation18_spill]]  ;;  %s3576_s11 = sld [smem:[#allocation16_spill]] }
0x10f0   : > { %s3577_s23 = sld [smem:[#allocation20_spill]]  ;;  %s3578_s24 = sld [smem:[#allocation17_spill]] }
0x10f1   : > { %s3579_s25 = sld [smem:[#allocation19_spill]]  ;;  %s3580_s21 = smov %s2847_s22 }
0x10f5   : > { %s30_s26 = sadd.s32 1, %s3575_s8   ;;  %s3581_s22 = smov %s3576_s11 }
0x10f6   : > { %p27_p4 = scmp.ge.s32.totalorder %s30_s26, 4  }
0x10f8   :  { %29 = sbr.rel (!%p27_p4) target bundleno = 16 (0x10), region = 172 }
0x10ff   :  { %2021 = vsyncpa [#allocation3], 1 }
0x1100   :  { %2023 = vsyncpa [#allocation3 + $0x1], 1 }
0x1101   :  { %2024 = vsyncpa [#allocation6], 1 }
0x1102   :  { %2026 = vsyncpa [#allocation6 + $0x1], 1 }
0x1103   :  { %2027 = vsyncpa [#allocation9], 1 }
0x1104   :  { %2029 = vsyncpa [#allocation9 + $0x1], 1 }
0x1105   :  { %2030 = vsyncpa [#allocation4], 1 }
0x1106   :  { %2032 = vsyncpa [#allocation4 + $0x1], 1 }

</bundles_post_ra>
